<compile_context>
chip_gen: v7x
topology: tpu7x:2x2x1
jax: 0.10.0
libtpu: 0.0.40
codegen_flags: <defaults>
</compile_context>

<pallas_src>
import functools
import math

import jax
import jax.numpy as jnp
from jax.experimental import pallas as pl
from jax.experimental.pallas import tpu as pltpu

LN_EPS = 1e-5  # PyTorch LayerNorm default


def _layernorm(x, gamma, beta):
    # x: (M, D); gamma/beta: (1, D). Biased variance, like torch.nn.LayerNorm.
    mean = jnp.mean(x, axis=-1, keepdims=True)
    var = jnp.mean(jnp.square(x - mean), axis=-1, keepdims=True)
    inv = jax.lax.rsqrt(var + LN_EPS)
    return (x - mean) * inv * gamma + beta


def trans_kernel(x_ref,
                 wq_ref, wk_ref, wv_ref, bq_ref, bk_ref, bv_ref,
                 wo_ref, bo_ref, ln1g_ref, ln1b_ref,
                 w1_ref, b1_ref, w2_ref, b2_ref, ln2g_ref, ln2b_ref,
                 o_ref, xt_ref,
                 *, nhead, batch, seq, d_model):
    l = pl.program_id(0)
    B, S, D, H = batch, seq, d_model, nhead
    dh = D // H
    scale = 1.0 / math.sqrt(dh)

    # First layer: load the (B*S, D) token slab into the VMEM carry.
    @pl.when(l == 0)
    def _():
        xt_ref[...] = x_ref[...]

    xt = xt_ref[...]                                   # (B*S, D) f32 activation carry
    xb = xt.astype(jnp.bfloat16)

    # ---- multi-head self-attention ------------------------------------------
    # Separate projections => Q/K/V land lane-aligned, no fused-qkv lane slices.
    q = jnp.dot(xb, wq_ref[...], preferred_element_type=jnp.float32) + bq_ref[...]
    k = jnp.dot(xb, wk_ref[...], preferred_element_type=jnp.float32) + bk_ref[...]
    v = jnp.dot(xb, wv_ref[...], preferred_element_type=jnp.float32) + bv_ref[...]

    # (B*S, D) -> (B, S, D): sublane split only (lane dim untouched) -> cheap.
    qb = q.astype(jnp.bfloat16).reshape(B, S, D)
    kb = k.astype(jnp.bfloat16).reshape(B, S, D)
    vb = v.astype(jnp.bfloat16).reshape(B, S, D)

    ctx_heads = []
    for h in range(H):                                  # static unroll, H small
        sl = slice(h * dh, (h + 1) * dh)
        qh, kh, vh = qb[:, :, sl], kb[:, :, sl], vb[:, :, sl]     # (B, S, dh) bf16
        s = jnp.einsum('bsd,btd->bst', qh, kh,
                       preferred_element_type=jnp.float32) * scale  # (B, S, S) f32
        m = jnp.max(s, axis=-1, keepdims=True)
        e = jnp.exp(s - m)
        p = e * pl.reciprocal(jnp.sum(e, axis=-1, keepdims=True), approx=True)
        ctx_heads.append(jnp.einsum('bst,btd->bsd', p.astype(jnp.bfloat16), vh,
                                    preferred_element_type=jnp.float32))
    ctx = jnp.concatenate(ctx_heads, axis=-1).reshape(B * S, D)      # (B*S, D) f32

    attn = jnp.dot(ctx.astype(jnp.bfloat16), wo_ref[...],
                   preferred_element_type=jnp.float32) + bo_ref[...]
    y = _layernorm(xt + attn, ln1g_ref[...], ln1b_ref[...])          # post-norm

    # ---- feed-forward ---------------------------------------------------------
    h1 = jnp.dot(y.astype(jnp.bfloat16), w1_ref[...],
                 preferred_element_type=jnp.float32) + b1_ref[...]
    h1 = jnp.maximum(h1, 0.0)                                        # ReLU
    h2 = jnp.dot(h1.astype(jnp.bfloat16), w2_ref[...],
                 preferred_element_type=jnp.float32) + b2_ref[...]
    new_xt = _layernorm(y + h2, ln2g_ref[...], ln2b_ref[...])

    xt_ref[...] = new_xt

    # ---- fused min-max normalization + output (last layer only) --------------
    @pl.when(l == pl.num_programs(0) - 1)
    def _():
        # TODO(synk): min_max_normalization is not defined in the provided source;
        # implemented as global (x - min) / (max - min); eps guards the constant
        # input (zero-range) 0/0 case.
        mn = jnp.min(new_xt)
        mx = jnp.max(new_xt)
        o_ref[...] = ((new_xt - mn) / jnp.maximum(mx - mn, 1e-12)).astype(o_ref.dtype)


# Call-argument order (must match the kernel signature).
_W_NAMES = ("wq", "wk", "wv", "bq", "bk", "bv", "wout", "bout",
            "ln1g", "ln1b", "w1", "b1", "w2", "b2", "ln2g", "ln2b")


def trans_forward(x_sbd, params, nhead):
    # x_sbd: (S, B, D) like PyTorch (batch_first=False).  The (S,B,D)->(B*S,D)
    # batch-major reorder is done here in XLA (tiny, one-time) so the kernel never
    # repacks layout.
    S, B, D = x_sbd.shape
    L = params["wq"].shape[0]
    x_tokens = jnp.transpose(x_sbd, (1, 0, 2)).reshape(B * S, D)

    kernel = functools.partial(trans_kernel, nhead=nhead, batch=B, seq=S, d_model=D)
    weight_args = [params[n] for n in _W_NAMES]

    def per_layer_spec(arr):
        # Stream one layer's block per grid step (leading layer axis squeezed out).
        return pl.BlockSpec((None, arr.shape[1], arr.shape[2]), lambda l: (l, 0, 0))

    in_specs = [pl.BlockSpec((B * S, D), lambda l: (0, 0))]
    in_specs += [per_layer_spec(w) for w in weight_args]

    out = pl.pallas_call(
        kernel,
        out_shape=jax.ShapeDtypeStruct((B * S, D), jnp.float32),
        grid=(L,),
        in_specs=in_specs,
        out_specs=pl.BlockSpec((B * S, D), lambda l: (0, 0)),
        scratch_shapes=[pltpu.VMEM((B * S, D), jnp.float32)],
        compiler_params=pltpu.CompilerParams(dimension_semantics=("arbitrary",)),
    )(x_tokens, *weight_args)

    return jnp.transpose(out.reshape(B, S, D), (1, 0, 2))


def init_layer_params(key, d_model, dim_ff):
    ks = jax.random.split(key, 10)
    s = 0.05
    f32 = jnp.float32
    return {
        "wq": jax.random.normal(ks[0], (d_model, d_model), f32) * s,
        "wk": jax.random.normal(ks[1], (d_model, d_model), f32) * s,
        "wv": jax.random.normal(ks[2], (d_model, d_model), f32) * s,
        "bq": jax.random.normal(ks[3], (1, d_model), f32) * s,
        "bk": jax.random.normal(ks[4], (1, d_model), f32) * s,
        "bv": jax.random.normal(ks[5], (1, d_model), f32) * s,
        "wout": jax.random.normal(ks[6], (d_model, d_model), f32) * s,
        "bout": jax.random.normal(ks[7], (1, d_model), f32) * s,
        "ln1g": jnp.ones((1, d_model), f32),
        "ln1b": jnp.zeros((1, d_model), f32),
        "w1": jax.random.normal(ks[8], (d_model, dim_ff), f32) * s,
        "b1": jnp.zeros((1, dim_ff), f32),
        "w2": jax.random.normal(ks[9], (dim_ff, d_model), f32) * s,
        "b2": jnp.zeros((1, d_model), f32),
        "ln2g": jnp.ones((1, d_model), f32),
        "ln2b": jnp.zeros((1, d_model), f32),
    }


_MATMUL_WEIGHTS = ("wq", "wk", "wv", "wout", "w1", "w2")


def init_params(key, d_model, dim_ff, num_layers):
    keys = jax.random.split(key, num_layers)
    per_layer = [init_layer_params(k, d_model, dim_ff) for k in keys]
    stacked = {name: jnp.stack([p[name] for p in per_layer], axis=0)
               for name in per_layer[0]}
    # MXU operands stored bf16 (native MXU dtype on all generations, halves weight
    # DMA/VMEM).  Biases / LayerNorm params stay f32 (vector math stays f32).
    for name in _MATMUL_WEIGHTS:
        stacked[name] = stacked[name].astype(jnp.bfloat16)
    return stacked


if __name__ == "__main__":
    d_model, nhead, dim_feedforward, num_layers = 32, 4, 64, 2
    S, B = 8, 2

    key = jax.random.PRNGKey(0)
    kx, kp = jax.random.split(key)
    x = jax.random.normal(kx, (S, B, d_model), jnp.float32)
    params = init_params(kp, d_model, dim_feedforward, num_layers)

    fwd = jax.jit(trans_forward, static_argnums=2)
    out = fwd(x, params, nhead)
    jax.block_until_ready(out)
    assert out.shape == (S, B, d_model)
    assert bool(jnp.all(jnp.isfinite(out)))
    print("KERNEL_OK")
</pallas_src>

<mosaic_0001>
module attributes {stable_mosaic.version = 11 : i64} {
  func.func @trans_kernel(%arg0: i32, %arg1: memref<16x32xf32, #tpu.memory_space<vmem>>, %arg2: memref<1x32x32xbf16, #tpu.memory_space<vmem>>, %arg3: memref<1x32x32xbf16, #tpu.memory_space<vmem>>, %arg4: memref<1x32x32xbf16, #tpu.memory_space<vmem>>, %arg5: memref<1x1x32xf32, #tpu.memory_space<vmem>>, %arg6: memref<1x1x32xf32, #tpu.memory_space<vmem>>, %arg7: memref<1x1x32xf32, #tpu.memory_space<vmem>>, %arg8: memref<1x32x32xbf16, #tpu.memory_space<vmem>>, %arg9: memref<1x1x32xf32, #tpu.memory_space<vmem>>, %arg10: memref<1x1x32xf32, #tpu.memory_space<vmem>>, %arg11: memref<1x1x32xf32, #tpu.memory_space<vmem>>, %arg12: memref<1x32x64xbf16, #tpu.memory_space<vmem>>, %arg13: memref<1x1x64xf32, #tpu.memory_space<vmem>>, %arg14: memref<1x64x32xbf16, #tpu.memory_space<vmem>>, %arg15: memref<1x1x32xf32, #tpu.memory_space<vmem>>, %arg16: memref<1x1x32xf32, #tpu.memory_space<vmem>>, %arg17: memref<1x1x32xf32, #tpu.memory_space<vmem>>, %arg18: memref<16x32xf32, #tpu.memory_space<vmem>>, %arg19: memref<16x32xf32, #tpu.memory_space<vmem>>) attributes {dimension_semantics = [#tpu.dimension_semantics<arbitrary>], iteration_bounds = array<i64: 2>, scalar_prefetch = 0 : i64, scratch_operands = 1 : i64, tpu.core_type = #tpu.core_type<tc>, window_params = [{pipeline_mode = #tpu.pipeline_mode<synchronous>, transform_indices = @transform_0, window_bounds = array<i64: 16, 32>}, {transform_indices = @transform_1, window_bounds = array<i64: 1, 32, 32>}, {transform_indices = @transform_2, window_bounds = array<i64: 1, 32, 32>}, {transform_indices = @transform_3, window_bounds = array<i64: 1, 32, 32>}, {transform_indices = @transform_4, window_bounds = array<i64: 1, 1, 32>}, {transform_indices = @transform_5, window_bounds = array<i64: 1, 1, 32>}, {transform_indices = @transform_6, window_bounds = array<i64: 1, 1, 32>}, {transform_indices = @transform_7, window_bounds = array<i64: 1, 32, 32>}, {transform_indices = @transform_8, window_bounds = array<i64: 1, 1, 32>}, {transform_indices = @transform_9, window_bounds = array<i64: 1, 1, 32>}, {transform_indices = @transform_10, window_bounds = array<i64: 1, 1, 32>}, {transform_indices = @transform_11, window_bounds = array<i64: 1, 32, 64>}, {transform_indices = @transform_12, window_bounds = array<i64: 1, 1, 64>}, {transform_indices = @transform_13, window_bounds = array<i64: 1, 64, 32>}, {transform_indices = @transform_14, window_bounds = array<i64: 1, 1, 32>}, {transform_indices = @transform_15, window_bounds = array<i64: 1, 1, 32>}, {transform_indices = @transform_16, window_bounds = array<i64: 1, 1, 32>}, {pipeline_mode = #tpu.pipeline_mode<synchronous>, transform_indices = @transform_17, window_bounds = array<i64: 16, 32>}]} {
    %c0_i32 = arith.constant 0 : i32
    %0 = arith.cmpi eq, %arg0, %c0_i32 : i32
    %1 = arith.extui %0 : i1 to i32
    %c0_i32_0 = arith.constant 0 : i32
    %2 = arith.cmpi ne, %1, %c0_i32_0 : i32
    scf.if %2 {
      %c0_89 = arith.constant 0 : index
      %c0_90 = arith.constant 0 : index
      %190 = vector.load %arg1[%c0_89, %c0_90] : memref<16x32xf32, #tpu.memory_space<vmem>>, vector<16x32xf32>
      %c0_91 = arith.constant 0 : index
      %c0_92 = arith.constant 0 : index
      %191 = vector.load %arg19[%c0_91, %c0_92] : memref<16x32xf32, #tpu.memory_space<vmem>>, vector<16x32xf32>
      tpu.vector_store %arg19[%c0_91, %c0_92], %190 {strides = array<i32>} : memref<16x32xf32, #tpu.memory_space<vmem>>, vector<16x32xf32>,
    } else {
    }
    %c0 = arith.constant 0 : index
    %c0_1 = arith.constant 0 : index
    %3 = vector.load %arg19[%c0, %c0_1] : memref<16x32xf32, #tpu.memory_space<vmem>>, vector<16x32xf32>
    %4 = arith.truncf %3 : vector<16x32xf32> to vector<16x32xbf16>
    %c0_2 = arith.constant 0 : index
    %c0_3 = arith.constant 0 : index
    %c0_4 = arith.constant 0 : index
    %5 = vector.load %arg2[%c0_2, %c0_3, %c0_4] : memref<1x32x32xbf16, #tpu.memory_space<vmem>>, vector<1x32x32xbf16>
    %6 = vector.shape_cast %5 : vector<1x32x32xbf16> to vector<32x32xbf16>
    %cst = arith.constant dense<0.000000e+00> : vector<16x32xf32>
    %7 = tpu.matmul %4, %6, %cst {dimension_numbers = #tpu.dot_dimension_numbers<[1], [0], [0], [1], [0, 0, 1, 1], [], []>} : vector<16x32xbf16>, vector<32x32xbf16>, vector<16x32xf32> -> vector<16x32xf32>
    %c0_5 = arith.constant 0 : index
    %c0_6 = arith.constant 0 : index
    %c0_7 = arith.constant 0 : index
    %8 = vector.load %arg5[%c0_5, %c0_6, %c0_7] : memref<1x1x32xf32, #tpu.memory_space<vmem>>, vector<1x1x32xf32>
    %9 = vector.shape_cast %8 : vector<1x1x32xf32> to vector<1x32xf32>
    %10 = vector.broadcast %9 : vector<1x32xf32> to vector<16x32xf32>
    %11 = arith.addf %7, %10 : vector<16x32xf32>
    %c0_8 = arith.constant 0 : index
    %c0_9 = arith.constant 0 : index
    %c0_10 = arith.constant 0 : index
    %12 = vector.load %arg3[%c0_8, %c0_9, %c0_10] : memref<1x32x32xbf16, #tpu.memory_space<vmem>>, vector<1x32x32xbf16>
    %13 = vector.shape_cast %12 : vector<1x32x32xbf16> to vector<32x32xbf16>
    %cst_11 = arith.constant dense<0.000000e+00> : vector<16x32xf32>
    %14 = tpu.matmul %4, %13, %cst_11 {dimension_numbers = #tpu.dot_dimension_numbers<[1], [0], [0], [1], [0, 0, 1, 1], [], []>} : vector<16x32xbf16>, vector<32x32xbf16>, vector<16x32xf32> -> vector<16x32xf32>
    %c0_12 = arith.constant 0 : index
    %c0_13 = arith.constant 0 : index
    %c0_14 = arith.constant 0 : index
    %15 = vector.load %arg6[%c0_12, %c0_13, %c0_14] : memref<1x1x32xf32, #tpu.memory_space<vmem>>, vector<1x1x32xf32>
    %16 = vector.shape_cast %15 : vector<1x1x32xf32> to vector<1x32xf32>
    %17 = vector.broadcast %16 : vector<1x32xf32> to vector<16x32xf32>
    %18 = arith.addf %14, %17 : vector<16x32xf32>
    %c0_15 = arith.constant 0 : index
    %c0_16 = arith.constant 0 : index
    %c0_17 = arith.constant 0 : index
    %19 = vector.load %arg4[%c0_15, %c0_16, %c0_17] : memref<1x32x32xbf16, #tpu.memory_space<vmem>>, vector<1x32x32xbf16>
    %20 = vector.shape_cast %19 : vector<1x32x32xbf16> to vector<32x32xbf16>
    %cst_18 = arith.constant dense<0.000000e+00> : vector<16x32xf32>
    %21 = tpu.matmul %4, %20, %cst_18 {dimension_numbers = #tpu.dot_dimension_numbers<[1], [0], [0], [1], [0, 0, 1, 1], [], []>} : vector<16x32xbf16>, vector<32x32xbf16>, vector<16x32xf32> -> vector<16x32xf32>
    %c0_19 = arith.constant 0 : index
    %c0_20 = arith.constant 0 : index
    %c0_21 = arith.constant 0 : index
    %22 = vector.load %arg7[%c0_19, %c0_20, %c0_21] : memref<1x1x32xf32, #tpu.memory_space<vmem>>, vector<1x1x32xf32>
    %23 = vector.shape_cast %22 : vector<1x1x32xf32> to vector<1x32xf32>
    %24 = vector.broadcast %23 : vector<1x32xf32> to vector<16x32xf32>
    %25 = arith.addf %21, %24 : vector<16x32xf32>
    %26 = arith.truncf %11 : vector<16x32xf32> to vector<16x32xbf16>
    %27 = vector.shape_cast %26 : vector<16x32xbf16> to vector<2x8x32xbf16>
    %28 = arith.truncf %18 : vector<16x32xf32> to vector<16x32xbf16>
    %29 = vector.shape_cast %28 : vector<16x32xbf16> to vector<2x8x32xbf16>
    %30 = arith.truncf %25 : vector<16x32xf32> to vector<16x32xbf16>
    %31 = vector.shape_cast %30 : vector<16x32xbf16> to vector<2x8x32xbf16>
    %32 = vector.extract_strided_slice %27 {offsets = [0, 0, 0], sizes = [2, 8, 8], strides = [1, 1, 1]} : vector<2x8x32xbf16> to vector<2x8x8xbf16>
    %33 = vector.extract_strided_slice %29 {offsets = [0, 0, 0], sizes = [2, 8, 8], strides = [1, 1, 1]} : vector<2x8x32xbf16> to vector<2x8x8xbf16>
    %34 = vector.extract_strided_slice %31 {offsets = [0, 0, 0], sizes = [2, 8, 8], strides = [1, 1, 1]} : vector<2x8x32xbf16> to vector<2x8x8xbf16>
    "tpu.trace_start"() <{level = 10 : i32, message = "bsd,btd->bst"}> : () -> ()
    %cst_22 = arith.constant dense<0.000000e+00> : vector<2x8x8xf32>
    %35 = tpu.matmul %32, %33, %cst_22 {dimension_numbers = #tpu.dot_dimension_numbers<[2], [2], [1], [1], [0, 0, 0, 1, 1, 1], [0], [0]>} : vector<2x8x8xbf16>, vector<2x8x8xbf16>, vector<2x8x8xf32> -> vector<2x8x8xf32>
    "tpu.trace_stop"() : () -> ()
    %cst_23 = arith.constant 0.353553385 : f32
    %36 = vector.broadcast %cst_23 : f32 to vector<2x8x8xf32>
    %37 = arith.mulf %35, %36 : vector<2x8x8xf32>
    %cst_24 = arith.constant dense<0xFF800000> : vector<2x8xf32>
    %38 = vector.multi_reduction <maximumf>, %37, %cst_24 [2] : vector<2x8x8xf32> to vector<2x8xf32>
    %39 = vector.shape_cast %38 : vector<2x8xf32> to vector<2x8x1xf32>
    %40 = vector.broadcast %39 : vector<2x8x1xf32> to vector<2x8x8xf32>
    %41 = arith.subf %37, %40 : vector<2x8x8xf32>
    %42 = math.exp %41 : vector<2x8x8xf32>
    %cst_25 = arith.constant dense<0.000000e+00> : vector<2x8xf32>
    %43 = vector.multi_reduction <add>, %42, %cst_25 [2] : vector<2x8x8xf32> to vector<2x8xf32>
    %44 = vector.shape_cast %43 : vector<2x8xf32> to vector<2x8x1xf32>
    %45 = tpu.reciprocal %44 {approx = true} : vector<2x8x1xf32> -> vector<2x8x1xf32>
    %46 = vector.broadcast %45 : vector<2x8x1xf32> to vector<2x8x8xf32>
    %47 = arith.mulf %42, %46 : vector<2x8x8xf32>
    %48 = arith.truncf %47 : vector<2x8x8xf32> to vector<2x8x8xbf16>
    "tpu.trace_start"() <{level = 10 : i32, message = "bst,btd->bsd"}> : () -> ()
    %cst_26 = arith.constant dense<0.000000e+00> : vector<2x8x8xf32>
    %49 = tpu.matmul %48, %34, %cst_26 {dimension_numbers = #tpu.dot_dimension_numbers<[2], [1], [1], [2], [0, 0, 0, 1, 1, 2], [0], [0]>} : vector<2x8x8xbf16>, vector<2x8x8xbf16>, vector<2x8x8xf32> -> vector<2x8x8xf32>
    "tpu.trace_stop"() : () -> ()
    %50 = vector.extract_strided_slice %27 {offsets = [0, 0, 8], sizes = [2, 8, 8], strides = [1, 1, 1]} : vector<2x8x32xbf16> to vector<2x8x8xbf16>
    %51 = vector.extract_strided_slice %29 {offsets = [0, 0, 8], sizes = [2, 8, 8], strides = [1, 1, 1]} : vector<2x8x32xbf16> to vector<2x8x8xbf16>
    %52 = vector.extract_strided_slice %31 {offsets = [0, 0, 8], sizes = [2, 8, 8], strides = [1, 1, 1]} : vector<2x8x32xbf16> to vector<2x8x8xbf16>
    "tpu.trace_start"() <{level = 10 : i32, message = "bsd,btd->bst"}> : () -> ()
    %cst_27 = arith.constant dense<0.000000e+00> : vector<2x8x8xf32>
    %53 = tpu.matmul %50, %51, %cst_27 {dimension_numbers = #tpu.dot_dimension_numbers<[2], [2], [1], [1], [0, 0, 0, 1, 1, 1], [0], [0]>} : vector<2x8x8xbf16>, vector<2x8x8xbf16>, vector<2x8x8xf32> -> vector<2x8x8xf32>
    "tpu.trace_stop"() : () -> ()
    %cst_28 = arith.constant 0.353553385 : f32
    %54 = vector.broadcast %cst_28 : f32 to vector<2x8x8xf32>
    %55 = arith.mulf %53, %54 : vector<2x8x8xf32>
    %cst_29 = arith.constant dense<0xFF800000> : vector<2x8xf32>
    %56 = vector.multi_reduction <maximumf>, %55, %cst_29 [2] : vector<2x8x8xf32> to vector<2x8xf32>
    %57 = vector.shape_cast %56 : vector<2x8xf32> to vector<2x8x1xf32>
    %58 = vector.broadcast %57 : vector<2x8x1xf32> to vector<2x8x8xf32>
    %59 = arith.subf %55, %58 : vector<2x8x8xf32>
    %60 = math.exp %59 : vector<2x8x8xf32>
    %cst_30 = arith.constant dense<0.000000e+00> : vector<2x8xf32>
    %61 = vector.multi_reduction <add>, %60, %cst_30 [2] : vector<2x8x8xf32> to vector<2x8xf32>
    %62 = vector.shape_cast %61 : vector<2x8xf32> to vector<2x8x1xf32>
    %63 = tpu.reciprocal %62 {approx = true} : vector<2x8x1xf32> -> vector<2x8x1xf32>
    %64 = vector.broadcast %63 : vector<2x8x1xf32> to vector<2x8x8xf32>
    %65 = arith.mulf %60, %64 : vector<2x8x8xf32>
    %66 = arith.truncf %65 : vector<2x8x8xf32> to vector<2x8x8xbf16>
    "tpu.trace_start"() <{level = 10 : i32, message = "bst,btd->bsd"}> : () -> ()
    %cst_31 = arith.constant dense<0.000000e+00> : vector<2x8x8xf32>
    %67 = tpu.matmul %66, %52, %cst_31 {dimension_numbers = #tpu.dot_dimension_numbers<[2], [1], [1], [2], [0, 0, 0, 1, 1, 2], [0], [0]>} : vector<2x8x8xbf16>, vector<2x8x8xbf16>, vector<2x8x8xf32> -> vector<2x8x8xf32>
    "tpu.trace_stop"() : () -> ()
    %68 = vector.extract_strided_slice %27 {offsets = [0, 0, 16], sizes = [2, 8, 8], strides = [1, 1, 1]} : vector<2x8x32xbf16> to vector<2x8x8xbf16>
    %69 = vector.extract_strided_slice %29 {offsets = [0, 0, 16], sizes = [2, 8, 8], strides = [1, 1, 1]} : vector<2x8x32xbf16> to vector<2x8x8xbf16>
    %70 = vector.extract_strided_slice %31 {offsets = [0, 0, 16], sizes = [2, 8, 8], strides = [1, 1, 1]} : vector<2x8x32xbf16> to vector<2x8x8xbf16>
    "tpu.trace_start"() <{level = 10 : i32, message = "bsd,btd->bst"}> : () -> ()
    %cst_32 = arith.constant dense<0.000000e+00> : vector<2x8x8xf32>
    %71 = tpu.matmul %68, %69, %cst_32 {dimension_numbers = #tpu.dot_dimension_numbers<[2], [2], [1], [1], [0, 0, 0, 1, 1, 1], [0], [0]>} : vector<2x8x8xbf16>, vector<2x8x8xbf16>, vector<2x8x8xf32> -> vector<2x8x8xf32>
    "tpu.trace_stop"() : () -> ()
    %cst_33 = arith.constant 0.353553385 : f32
    %72 = vector.broadcast %cst_33 : f32 to vector<2x8x8xf32>
    %73 = arith.mulf %71, %72 : vector<2x8x8xf32>
    %cst_34 = arith.constant dense<0xFF800000> : vector<2x8xf32>
    %74 = vector.multi_reduction <maximumf>, %73, %cst_34 [2] : vector<2x8x8xf32> to vector<2x8xf32>
    %75 = vector.shape_cast %74 : vector<2x8xf32> to vector<2x8x1xf32>
    %76 = vector.broadcast %75 : vector<2x8x1xf32> to vector<2x8x8xf32>
    %77 = arith.subf %73, %76 : vector<2x8x8xf32>
    %78 = math.exp %77 : vector<2x8x8xf32>
    %cst_35 = arith.constant dense<0.000000e+00> : vector<2x8xf32>
    %79 = vector.multi_reduction <add>, %78, %cst_35 [2] : vector<2x8x8xf32> to vector<2x8xf32>
    %80 = vector.shape_cast %79 : vector<2x8xf32> to vector<2x8x1xf32>
    %81 = tpu.reciprocal %80 {approx = true} : vector<2x8x1xf32> -> vector<2x8x1xf32>
    %82 = vector.broadcast %81 : vector<2x8x1xf32> to vector<2x8x8xf32>
    %83 = arith.mulf %78, %82 : vector<2x8x8xf32>
    %84 = arith.truncf %83 : vector<2x8x8xf32> to vector<2x8x8xbf16>
    "tpu.trace_start"() <{level = 10 : i32, message = "bst,btd->bsd"}> : () -> ()
    %cst_36 = arith.constant dense<0.000000e+00> : vector<2x8x8xf32>
    %85 = tpu.matmul %84, %70, %cst_36 {dimension_numbers = #tpu.dot_dimension_numbers<[2], [1], [1], [2], [0, 0, 0, 1, 1, 2], [0], [0]>} : vector<2x8x8xbf16>, vector<2x8x8xbf16>, vector<2x8x8xf32> -> vector<2x8x8xf32>
    "tpu.trace_stop"() : () -> ()
    %86 = vector.extract_strided_slice %27 {offsets = [0, 0, 24], sizes = [2, 8, 8], strides = [1, 1, 1]} : vector<2x8x32xbf16> to vector<2x8x8xbf16>
    %87 = vector.extract_strided_slice %29 {offsets = [0, 0, 24], sizes = [2, 8, 8], strides = [1, 1, 1]} : vector<2x8x32xbf16> to vector<2x8x8xbf16>
    %88 = vector.extract_strided_slice %31 {offsets = [0, 0, 24], sizes = [2, 8, 8], strides = [1, 1, 1]} : vector<2x8x32xbf16> to vector<2x8x8xbf16>
    "tpu.trace_start"() <{level = 10 : i32, message = "bsd,btd->bst"}> : () -> ()
    %cst_37 = arith.constant dense<0.000000e+00> : vector<2x8x8xf32>
    %89 = tpu.matmul %86, %87, %cst_37 {dimension_numbers = #tpu.dot_dimension_numbers<[2], [2], [1], [1], [0, 0, 0, 1, 1, 1], [0], [0]>} : vector<2x8x8xbf16>, vector<2x8x8xbf16>, vector<2x8x8xf32> -> vector<2x8x8xf32>
    "tpu.trace_stop"() : () -> ()
    %cst_38 = arith.constant 0.353553385 : f32
    %90 = vector.broadcast %cst_38 : f32 to vector<2x8x8xf32>
    %91 = arith.mulf %89, %90 : vector<2x8x8xf32>
    %cst_39 = arith.constant dense<0xFF800000> : vector<2x8xf32>
    %92 = vector.multi_reduction <maximumf>, %91, %cst_39 [2] : vector<2x8x8xf32> to vector<2x8xf32>
    %93 = vector.shape_cast %92 : vector<2x8xf32> to vector<2x8x1xf32>
    %94 = vector.broadcast %93 : vector<2x8x1xf32> to vector<2x8x8xf32>
    %95 = arith.subf %91, %94 : vector<2x8x8xf32>
    %96 = math.exp %95 : vector<2x8x8xf32>
    %cst_40 = arith.constant dense<0.000000e+00> : vector<2x8xf32>
    %97 = vector.multi_reduction <add>, %96, %cst_40 [2] : vector<2x8x8xf32> to vector<2x8xf32>
    %98 = vector.shape_cast %97 : vector<2x8xf32> to vector<2x8x1xf32>
    %99 = tpu.reciprocal %98 {approx = true} : vector<2x8x1xf32> -> vector<2x8x1xf32>
    %100 = vector.broadcast %99 : vector<2x8x1xf32> to vector<2x8x8xf32>
    %101 = arith.mulf %96, %100 : vector<2x8x8xf32>
    %102 = arith.truncf %101 : vector<2x8x8xf32> to vector<2x8x8xbf16>
    "tpu.trace_start"() <{level = 10 : i32, message = "bst,btd->bsd"}> : () -> ()
    %cst_41 = arith.constant dense<0.000000e+00> : vector<2x8x8xf32>
    %103 = tpu.matmul %102, %88, %cst_41 {dimension_numbers = #tpu.dot_dimension_numbers<[2], [1], [1], [2], [0, 0, 0, 1, 1, 2], [0], [0]>} : vector<2x8x8xbf16>, vector<2x8x8xbf16>, vector<2x8x8xf32> -> vector<2x8x8xf32>
    "tpu.trace_stop"() : () -> ()
    %104 = tpu.concatenate %49, %67, %85, %103 in 2 : vector<2x8x8xf32>, vector<2x8x8xf32>, vector<2x8x8xf32>, vector<2x8x8xf32> -> vector<2x8x32xf32>
    %105 = vector.shape_cast %104 : vector<2x8x32xf32> to vector<16x32xf32>
    %106 = arith.truncf %105 : vector<16x32xf32> to vector<16x32xbf16>
    %c0_42 = arith.constant 0 : index
    %c0_43 = arith.constant 0 : index
    %c0_44 = arith.constant 0 : index
    %107 = vector.load %arg8[%c0_42, %c0_43, %c0_44] : memref<1x32x32xbf16, #tpu.memory_space<vmem>>, vector<1x32x32xbf16>
    %108 = vector.shape_cast %107 : vector<1x32x32xbf16> to vector<32x32xbf16>
    %cst_45 = arith.constant dense<0.000000e+00> : vector<16x32xf32>
    %109 = tpu.matmul %106, %108, %cst_45 {dimension_numbers = #tpu.dot_dimension_numbers<[1], [0], [0], [1], [0, 0, 1, 1], [], []>} : vector<16x32xbf16>, vector<32x32xbf16>, vector<16x32xf32> -> vector<16x32xf32>
    %c0_46 = arith.constant 0 : index
    %c0_47 = arith.constant 0 : index
    %c0_48 = arith.constant 0 : index
    %110 = vector.load %arg9[%c0_46, %c0_47, %c0_48] : memref<1x1x32xf32, #tpu.memory_space<vmem>>, vector<1x1x32xf32>
    %111 = vector.shape_cast %110 : vector<1x1x32xf32> to vector<1x32xf32>
    %112 = vector.broadcast %111 : vector<1x32xf32> to vector<16x32xf32>
    %113 = arith.addf %109, %112 : vector<16x32xf32>
    %114 = arith.addf %3, %113 : vector<16x32xf32>
    %c0_49 = arith.constant 0 : index
    %c0_50 = arith.constant 0 : index
    %c0_51 = arith.constant 0 : index
    %115 = vector.load %arg10[%c0_49, %c0_50, %c0_51] : memref<1x1x32xf32, #tpu.memory_space<vmem>>, vector<1x1x32xf32>
    %116 = vector.shape_cast %115 : vector<1x1x32xf32> to vector<1x32xf32>
    %c0_52 = arith.constant 0 : index
    %c0_53 = arith.constant 0 : index
    %c0_54 = arith.constant 0 : index
    %117 = vector.load %arg11[%c0_52, %c0_53, %c0_54] : memref<1x1x32xf32, #tpu.memory_space<vmem>>, vector<1x1x32xf32>
    %118 = vector.shape_cast %117 : vector<1x1x32xf32> to vector<1x32xf32>
    %cst_55 = arith.constant dense<0.000000e+00> : vector<16xf32>
    %119 = vector.multi_reduction <add>, %114, %cst_55 [1] : vector<16x32xf32> to vector<16xf32>
    %120 = vector.shape_cast %119 : vector<16xf32> to vector<16x1xf32>
    %cst_56 = arith.constant 3.200000e+01 : f32
    %121 = vector.broadcast %cst_56 : f32 to vector<16x1xf32>
    %122 = arith.divf %120, %121 : vector<16x1xf32>
    %123 = vector.broadcast %122 : vector<16x1xf32> to vector<16x32xf32>
    %124 = arith.subf %114, %123 : vector<16x32xf32>
    %125 = arith.mulf %124, %124 : vector<16x32xf32>
    %cst_57 = arith.constant dense<0.000000e+00> : vector<16xf32>
    %126 = vector.multi_reduction <add>, %125, %cst_57 [1] : vector<16x32xf32> to vector<16xf32>
    %127 = vector.shape_cast %126 : vector<16xf32> to vector<16x1xf32>
    %cst_58 = arith.constant 3.200000e+01 : f32
    %128 = vector.broadcast %cst_58 : f32 to vector<16x1xf32>
    %129 = arith.divf %127, %128 : vector<16x1xf32>
    %cst_59 = arith.constant 9.99999974E-6 : f32
    %130 = vector.broadcast %cst_59 : f32 to vector<16x1xf32>
    %131 = arith.addf %129, %130 : vector<16x1xf32>
    %132 = math.rsqrt %131 : vector<16x1xf32>
    %133 = vector.broadcast %122 : vector<16x1xf32> to vector<16x32xf32>
    %134 = arith.subf %114, %133 : vector<16x32xf32>
    %135 = vector.broadcast %132 : vector<16x1xf32> to vector<16x32xf32>
    %136 = arith.mulf %134, %135 : vector<16x32xf32>
    %137 = vector.broadcast %116 : vector<1x32xf32> to vector<16x32xf32>
    %138 = arith.mulf %136, %137 : vector<16x32xf32>
    %139 = vector.broadcast %118 : vector<1x32xf32> to vector<16x32xf32>
    %140 = arith.addf %138, %139 : vector<16x32xf32>
    %141 = arith.truncf %140 : vector<16x32xf32> to vector<16x32xbf16>
    %c0_60 = arith.constant 0 : index
    %c0_61 = arith.constant 0 : index
    %c0_62 = arith.constant 0 : index
    %142 = vector.load %arg12[%c0_60, %c0_61, %c0_62] : memref<1x32x64xbf16, #tpu.memory_space<vmem>>, vector<1x32x64xbf16>
    %143 = vector.shape_cast %142 : vector<1x32x64xbf16> to vector<32x64xbf16>
    %cst_63 = arith.constant dense<0.000000e+00> : vector<16x64xf32>
    %144 = tpu.matmul %141, %143, %cst_63 {dimension_numbers = #tpu.dot_dimension_numbers<[1], [0], [0], [1], [0, 0, 1, 1], [], []>} : vector<16x32xbf16>, vector<32x64xbf16>, vector<16x64xf32> -> vector<16x64xf32>
    %c0_64 = arith.constant 0 : index
    %c0_65 = arith.constant 0 : index
    %c0_66 = arith.constant 0 : index
    %145 = vector.load %arg13[%c0_64, %c0_65, %c0_66] : memref<1x1x64xf32, #tpu.memory_space<vmem>>, vector<1x1x64xf32>
    %146 = vector.shape_cast %145 : vector<1x1x64xf32> to vector<1x64xf32>
    %147 = vector.broadcast %146 : vector<1x64xf32> to vector<16x64xf32>
    %148 = arith.addf %144, %147 : vector<16x64xf32>
    %cst_67 = arith.constant 0.000000e+00 : f32
    %149 = vector.broadcast %cst_67 : f32 to vector<16x64xf32>
    %150 = arith.maximumf %148, %149 : vector<16x64xf32>
    %151 = arith.truncf %150 : vector<16x64xf32> to vector<16x64xbf16>
    %c0_68 = arith.constant 0 : index
    %c0_69 = arith.constant 0 : index
    %c0_70 = arith.constant 0 : index
    %152 = vector.load %arg14[%c0_68, %c0_69, %c0_70] : memref<1x64x32xbf16, #tpu.memory_space<vmem>>, vector<1x64x32xbf16>
    %153 = vector.shape_cast %152 : vector<1x64x32xbf16> to vector<64x32xbf16>
    %cst_71 = arith.constant dense<0.000000e+00> : vector<16x32xf32>
    %154 = tpu.matmul %151, %153, %cst_71 {dimension_numbers = #tpu.dot_dimension_numbers<[1], [0], [0], [1], [0, 0, 1, 1], [], []>} : vector<16x64xbf16>, vector<64x32xbf16>, vector<16x32xf32> -> vector<16x32xf32>
    %c0_72 = arith.constant 0 : index
    %c0_73 = arith.constant 0 : index
    %c0_74 = arith.constant 0 : index
    %155 = vector.load %arg15[%c0_72, %c0_73, %c0_74] : memref<1x1x32xf32, #tpu.memory_space<vmem>>, vector<1x1x32xf32>
    %156 = vector.shape_cast %155 : vector<1x1x32xf32> to vector<1x32xf32>
    %157 = vector.broadcast %156 : vector<1x32xf32> to vector<16x32xf32>
    %158 = arith.addf %154, %157 : vector<16x32xf32>
    %159 = arith.addf %140, %158 : vector<16x32xf32>
    %c0_75 = arith.constant 0 : index
    %c0_76 = arith.constant 0 : index
    %c0_77 = arith.constant 0 : index
    %160 = vector.load %arg16[%c0_75, %c0_76, %c0_77] : memref<1x1x32xf32, #tpu.memory_space<vmem>>, vector<1x1x32xf32>
    %161 = vector.shape_cast %160 : vector<1x1x32xf32> to vector<1x32xf32>
    %c0_78 = arith.constant 0 : index
    %c0_79 = arith.constant 0 : index
    %c0_80 = arith.constant 0 : index
    %162 = vector.load %arg17[%c0_78, %c0_79, %c0_80] : memref<1x1x32xf32, #tpu.memory_space<vmem>>, vector<1x1x32xf32>
    %163 = vector.shape_cast %162 : vector<1x1x32xf32> to vector<1x32xf32>
    %cst_81 = arith.constant dense<0.000000e+00> : vector<16xf32>
    %164 = vector.multi_reduction <add>, %159, %cst_81 [1] : vector<16x32xf32> to vector<16xf32>
    %165 = vector.shape_cast %164 : vector<16xf32> to vector<16x1xf32>
    %cst_82 = arith.constant 3.200000e+01 : f32
    %166 = vector.broadcast %cst_82 : f32 to vector<16x1xf32>
    %167 = arith.divf %165, %166 : vector<16x1xf32>
    %168 = vector.broadcast %167 : vector<16x1xf32> to vector<16x32xf32>
    %169 = arith.subf %159, %168 : vector<16x32xf32>
    %170 = arith.mulf %169, %169 : vector<16x32xf32>
    %cst_83 = arith.constant dense<0.000000e+00> : vector<16xf32>
    %171 = vector.multi_reduction <add>, %170, %cst_83 [1] : vector<16x32xf32> to vector<16xf32>
    %172 = vector.shape_cast %171 : vector<16xf32> to vector<16x1xf32>
    %cst_84 = arith.constant 3.200000e+01 : f32
    %173 = vector.broadcast %cst_84 : f32 to vector<16x1xf32>
    %174 = arith.divf %172, %173 : vector<16x1xf32>
    %cst_85 = arith.constant 9.99999974E-6 : f32
    %175 = vector.broadcast %cst_85 : f32 to vector<16x1xf32>
    %176 = arith.addf %174, %175 : vector<16x1xf32>
    %177 = math.rsqrt %176 : vector<16x1xf32>
    %178 = vector.broadcast %167 : vector<16x1xf32> to vector<16x32xf32>
    %179 = arith.subf %159, %178 : vector<16x32xf32>
    %180 = vector.broadcast %177 : vector<16x1xf32> to vector<16x32xf32>
    %181 = arith.mulf %179, %180 : vector<16x32xf32>
    %182 = vector.broadcast %161 : vector<1x32xf32> to vector<16x32xf32>
    %183 = arith.mulf %181, %182 : vector<16x32xf32>
    %184 = vector.broadcast %163 : vector<1x32xf32> to vector<16x32xf32>
    %185 = arith.addf %183, %184 : vector<16x32xf32>
    %c0_86 = arith.constant 0 : index
    %c0_87 = arith.constant 0 : index
    %186 = vector.load %arg19[%c0_86, %c0_87] : memref<16x32xf32, #tpu.memory_space<vmem>>, vector<16x32xf32>
    tpu.vector_store %arg19[%c0_86, %c0_87], %185 {strides = array<i32>} : memref<16x32xf32, #tpu.memory_space<vmem>>, vector<16x32xf32>,
    %c1_i32 = arith.constant 1 : i32
    %187 = arith.cmpi eq, %arg0, %c1_i32 : i32
    %188 = arith.extui %187 : i1 to i32
    %c0_i32_88 = arith.constant 0 : i32
    %189 = arith.cmpi ne, %188, %c0_i32_88 : i32
    scf.if %189 {
      %190 = vector.shape_cast %185 : vector<16x32xf32> to vector<1x16x32xf32>
      %cst_89 = arith.constant dense<0x7F800000> : vector<1xf32>
      %191 = vector.multi_reduction <minimumf>, %190, %cst_89 [1, 2] : vector<1x16x32xf32> to vector<1xf32>
      %192 = vector.shape_cast %191 : vector<1xf32> to vector<1x1x1xf32>
      %193 = vector.extract %192[0, 0, 0] : f32 from vector<1x1x1xf32>
      %194 = vector.shape_cast %185 : vector<16x32xf32> to vector<1x16x32xf32>
      %cst_90 = arith.constant dense<0xFF800000> : vector<1xf32>
      %195 = vector.multi_reduction <maximumf>, %194, %cst_90 [1, 2] : vector<1x16x32xf32> to vector<1xf32>
      %196 = vector.shape_cast %195 : vector<1xf32> to vector<1x1x1xf32>
      %197 = vector.extract %196[0, 0, 0] : f32 from vector<1x1x1xf32>
      %198 = vector.broadcast %193 : f32 to vector<16x32xf32>
      %199 = arith.subf %185, %198 : vector<16x32xf32>
      %200 = arith.subf %197, %193 : f32
      %cst_91 = arith.constant 9.99999996E-13 : f32
      %201 = arith.maximumf %200, %cst_91 : f32
      %202 = vector.broadcast %201 : f32 to vector<16x32xf32>
      %203 = arith.divf %199, %202 : vector<16x32xf32>
      %c0_92 = arith.constant 0 : index
      %c0_93 = arith.constant 0 : index
      %204 = vector.load %arg18[%c0_92, %c0_93] : memref<16x32xf32, #tpu.memory_space<vmem>>, vector<16x32xf32>
      tpu.vector_store %arg18[%c0_92, %c0_93], %203 {strides = array<i32>} : memref<16x32xf32, #tpu.memory_space<vmem>>, vector<16x32xf32>,
    } else {
    }
    return
  }
  func.func @transform_0(%arg0: i32) -> (i32, i32) {
    %c0_i32 = arith.constant 0 : i32
    %c0_i32_0 = arith.constant 0 : i32
    %c0_i32_1 = arith.constant 0 : i32
    return %c0_i32, %c0_i32_0 : i32, i32
  }
  func.func @transform_1(%arg0: i32) -> (i32, i32, i32) {
    %c0_i32 = arith.constant 0 : i32
    %c0_i32_0 = arith.constant 0 : i32
    %c0_i32_1 = arith.constant 0 : i32
    return %arg0, %c0_i32, %c0_i32_0 : i32, i32, i32
  }
  func.func @transform_2(%arg0: i32) -> (i32, i32, i32) {
    %c0_i32 = arith.constant 0 : i32
    %c0_i32_0 = arith.constant 0 : i32
    %c0_i32_1 = arith.constant 0 : i32
    return %arg0, %c0_i32, %c0_i32_0 : i32, i32, i32
  }
  func.func @transform_3(%arg0: i32) -> (i32, i32, i32) {
    %c0_i32 = arith.constant 0 : i32
    %c0_i32_0 = arith.constant 0 : i32
    %c0_i32_1 = arith.constant 0 : i32
    return %arg0, %c0_i32, %c0_i32_0 : i32, i32, i32
  }
  func.func @transform_4(%arg0: i32) -> (i32, i32, i32) {
    %c0_i32 = arith.constant 0 : i32
    %c0_i32_0 = arith.constant 0 : i32
    %c0_i32_1 = arith.constant 0 : i32
    return %arg0, %c0_i32, %c0_i32_0 : i32, i32, i32
  }
  func.func @transform_5(%arg0: i32) -> (i32, i32, i32) {
    %c0_i32 = arith.constant 0 : i32
    %c0_i32_0 = arith.constant 0 : i32
    %c0_i32_1 = arith.constant 0 : i32
    return %arg0, %c0_i32, %c0_i32_0 : i32, i32, i32
  }
  func.func @transform_6(%arg0: i32) -> (i32, i32, i32) {
    %c0_i32 = arith.constant 0 : i32
    %c0_i32_0 = arith.constant 0 : i32
    %c0_i32_1 = arith.constant 0 : i32
    return %arg0, %c0_i32, %c0_i32_0 : i32, i32, i32
  }
  func.func @transform_7(%arg0: i32) -> (i32, i32, i32) {
    %c0_i32 = arith.constant 0 : i32
    %c0_i32_0 = arith.constant 0 : i32
    %c0_i32_1 = arith.constant 0 : i32
    return %arg0, %c0_i32, %c0_i32_0 : i32, i32, i32
  }
  func.func @transform_8(%arg0: i32) -> (i32, i32, i32) {
    %c0_i32 = arith.constant 0 : i32
    %c0_i32_0 = arith.constant 0 : i32
    %c0_i32_1 = arith.constant 0 : i32
    return %arg0, %c0_i32, %c0_i32_0 : i32, i32, i32
  }
  func.func @transform_9(%arg0: i32) -> (i32, i32, i32) {
    %c0_i32 = arith.constant 0 : i32
    %c0_i32_0 = arith.constant 0 : i32
    %c0_i32_1 = arith.constant 0 : i32
    return %arg0, %c0_i32, %c0_i32_0 : i32, i32, i32
  }
  func.func @transform_10(%arg0: i32) -> (i32, i32, i32) {
    %c0_i32 = arith.constant 0 : i32
    %c0_i32_0 = arith.constant 0 : i32
    %c0_i32_1 = arith.constant 0 : i32
    return %arg0, %c0_i32, %c0_i32_0 : i32, i32, i32
  }
  func.func @transform_11(%arg0: i32) -> (i32, i32, i32) {
    %c0_i32 = arith.constant 0 : i32
    %c0_i32_0 = arith.constant 0 : i32
    %c0_i32_1 = arith.constant 0 : i32
    return %arg0, %c0_i32, %c0_i32_0 : i32, i32, i32
  }
  func.func @transform_12(%arg0: i32) -> (i32, i32, i32) {
    %c0_i32 = arith.constant 0 : i32
    %c0_i32_0 = arith.constant 0 : i32
    %c0_i32_1 = arith.constant 0 : i32
    return %arg0, %c0_i32, %c0_i32_0 : i32, i32, i32
  }
  func.func @transform_13(%arg0: i32) -> (i32, i32, i32) {
    %c0_i32 = arith.constant 0 : i32
    %c0_i32_0 = arith.constant 0 : i32
    %c0_i32_1 = arith.constant 0 : i32
    return %arg0, %c0_i32, %c0_i32_0 : i32, i32, i32
  }
  func.func @transform_14(%arg0: i32) -> (i32, i32, i32) {
    %c0_i32 = arith.constant 0 : i32
    %c0_i32_0 = arith.constant 0 : i32
    %c0_i32_1 = arith.constant 0 : i32
    return %arg0, %c0_i32, %c0_i32_0 : i32, i32, i32
  }
  func.func @transform_15(%arg0: i32) -> (i32, i32, i32) {
    %c0_i32 = arith.constant 0 : i32
    %c0_i32_0 = arith.constant 0 : i32
    %c0_i32_1 = arith.constant 0 : i32
    return %arg0, %c0_i32, %c0_i32_0 : i32, i32, i32
  }
  func.func @transform_16(%arg0: i32) -> (i32, i32, i32) {
    %c0_i32 = arith.constant 0 : i32
    %c0_i32_0 = arith.constant 0 : i32
    %c0_i32_1 = arith.constant 0 : i32
    return %arg0, %c0_i32, %c0_i32_0 : i32, i32, i32
  }
  func.func @transform_17(%arg0: i32) -> (i32, i32) {
    %c0_i32 = arith.constant 0 : i32
    %c0_i32_0 = arith.constant 0 : i32
    %c0_i32_1 = arith.constant 0 : i32
    return %c0_i32, %c0_i32_0 : i32, i32
  }
}

</mosaic_0001>

<bundles_post_ra>
// kernel: trans_forward.1
= control target key start
LH: loop header
LB: loop body
LE: loop exit
PB: predicated region body
PF: predicated region fallthrough
CT: control target
= control target key end

     0   :  { %s4272_s0 = inlined_call_operand.vmem [shape: f32[16,32], index: 0, kind: input, shape index: {}]   ;;  %s4273_s1 = inlined_call_operand.vmem [shape: bf16[2,32,32], index: 1, kind: input, shape index: {}]   ;;  %s4274_s2 = inlined_call_operand.vmem [shape: bf16[2,32,32], index: 2, kind: input, shape index: {}]   ;;  %s4275_s3 = inlined_call_operand.vmem [shape: bf16[2,32,32], index: 3, kind: input, shape index: {}]   ;;  %s4276_s4 = inlined_call_operand.vmem [shape: f32[2,1,32], index: 4, kind: input, shape index: {}]   ;;  %s4277_s5 = inlined_call_operand.hbm [shape: f32[2,1,32], index: 5, kind: input, shape index: {}]   ;;  %s4278_s6 = inlined_call_operand.hbm [shape: f32[2,1,32], index: 6, kind: input, shape index: {}]   ;;  %s4279_s7 = inlined_call_operand.vmem [shape: bf16[2,32,32], index: 7, kind: input, shape index: {}]   ;;  %s4280_s8 = inlined_call_operand.hbm [shape: f32[2,1,32], index: 8, kind: input, shape index: {}]   ;;  %s4281_s9 = inlined_call_operand.hbm [shape: f32[2,1,32], index: 9, kind: input, shape index: {}]   ;;  %s4282_s10 = inlined_call_operand.hbm [shape: f32[2,1,32], index: 10, kind: input, shape index: {}]   ;;  %s4283_s11 = inlined_call_operand.hbm [shape: bf16[2,32,64], index: 11, kind: input, shape index: {}]   ;;  %s4284_s12 = inlined_call_operand.hbm [shape: f32[2,1,64], index: 12, kind: input, shape index: {}]   ;;  %s4285_s13 = inlined_call_operand.vmem [shape: bf16[2,64,32], index: 13, kind: input, shape index: {}]   ;;  %s4286_s14 = inlined_call_operand.hbm [shape: f32[2,1,32], index: 14, kind: input, shape index: {}]   ;;  %s4287_s15 = inlined_call_operand.vmem [shape: f32[2,1,32], index: 15, kind: input, shape index: {}]   ;;  %s4288_s16 = inlined_call_operand.hbm [shape: f32[2,1,32], index: 16, kind: input, shape index: {}]   ;;  %s4289_s17 = inlined_call_operand.vmem [shape: f32[16,32], index: 17, kind: output, shape index: {}]  }
   0x1   :  { %4302 = sst [smem:[#allocation25_spill]] %s4272_s0 }
   0x2   :  { %4303 = sst [smem:[#allocation26_spill]] %s4273_s1 }
   0x3   :  { %4304 = sst [smem:[#allocation27_spill]] %s4275_s3 }
   0x4   :  { %4305 = sst [smem:[#allocation28_spill]] %s4277_s5 }
   0x5   :  { %4306 = sst [smem:[#allocation29_spill]] %s4278_s6 }
   0x6   :  { %4307 = sst [smem:[#allocation30_spill]] %s4279_s7 }
   0x7   :  { %4308 = sst [smem:[#allocation31_spill]] %s4280_s8 }
   0x8   :  { %4309 = sst [smem:[#allocation32_spill]] %s4281_s9 }
   0x9   :  { %4310 = sst [smem:[#allocation33_spill]] %s4282_s10 }
   0xa   :  { %4311 = sst [smem:[#allocation34_spill]] %s4283_s11 }
   0xb   :  { %4312 = sst [smem:[#allocation35_spill]] %s4285_s13 }
   0xc   :  { %4313 = sst [smem:[#allocation36_spill]] %s4287_s15 }
   0xd   :  { %4314 = sst [smem:[#allocation37_spill]] %s4289_s17 }
   0xe   :  { %22 = vsyncpa [#allocation4], 0 }
   0xf   :  { %24 = vsyncpa [#allocation4 + $0x1], 0 }
  0x10   :  { %25 = vsyncpa [#allocation6], 0 }
  0x11   :  { %27 = vsyncpa [#allocation6 + $0x1], 0 }
  0x12   :  { %28 = vsyncpa [#allocation9], 0 }
  0x13   :  { %30 = vsyncpa [#allocation9 + $0x1], 0 }
  0x14   :  { %31 = vsyncpa [#allocation12], 0 }
  0x15   :  { %33 = vsyncpa [#allocation12 + $0x1], 0 }
  0x16   :  { %34 = vsyncpa [#allocation15], 0 }
  0x17   :  { %36 = vsyncpa [#allocation15 + $0x1], 0  ;;  %s3592_s24 = smov 0   ;;  %s3594_s25 = smov 0  }
  0x18   :  { %s3596_s26 = smov 0   ;;  %s3598_s27 = smov 0  }
  0x19 LB: > { %4315 = sst [smem:[#allocation22_spill]] %s3476_s26  ;;  %s3611_s28 = sadd.s32 4294967295, %s3480_s27   ;;  %s3480_s27 = sphi %s3598_s27, %s4359_s27   ;;  %s3476_s26 = sphi %s3596_s26, %s4361_s26   ;;  %s3472_s25 = sphi %s3594_s25, %s4363_s25   ;;  %s3468_s24 = sphi %s3592_s24, %s4362_s24  }
  0x1a   : > { %s3614_s29 = sadd.s32 1, %s3480_s27   ;;  %s174_s30 = sadd.s32 1, %s3476_s26 }
  0x1b   : > { %4316 = sst [smem:[#allocation23_spill]] %s3614_s29  ;;  %s171_s0 = ssub.s32 %s3480_s27, %s3614_s29 }
  0x1c   : > { %p172_p0 = scmp.eq.s32.totalorder %s171_s0, 0  ;;  %p181_p1 = scmp.ne.s32.totalorder %s3476_s26, %s3472_s25 }
  0x1d   : > { %p182_p2 = scmp.eq.s32.totalorder %s3480_s27, 0  ;;  %p187_p3 = scmp.ne.s32.totalorder %s3472_s25, %s3468_s24 }
  0x1e   : > { %s3624_s18 = scalar_select %p172_p0, %s3476_s26, %s174_s30  }
  0x1f   : > { %p183_p4 = por %p182_p2, %p181_p1  ;;  %p188_p5 = scmp.eq.s32.totalorder %s3611_s28, 0 }
  0x20   : > { %4317 = sst [smem:[#allocation24_spill]] %s3624_s18  ;;  %p3045_p6 = scmp.lt.s32.totalorder %s3480_s27, 2 }
  0x21   : > { %p3628_p7 = por %p188_p5, %p187_p3  ;;  %s3633_s1 = sand.u32 1, %s3476_s26  }
  0x22   : > { %s3636_s20 = sshll.u32 %s3480_s27, 4  ;;  %p3638_p8 = pnand %p3045_p6, %p183_p4 }
  0x23   : > { %s4318_s19 = scalar_select %p3628_p7, 1, 0 }
  0x24   : > { %s4319_s21 = scalar_select %p3638_p8, 1, 0 }
  0x25   : > { %s3643_s22 = sand.u32 1, %s3480_s27   ;;  %s4320_s6 = sld [smem:[#allocation29_spill]] }
  0x26   : > { %s571_s30 = scalar_lea.vmem [#allocation5], %s3633_s1  ;;  %p3660_p11 = pneg %p3638_p8 }
  0x27   : > { %s578_s18 = sshll.u32 %s571_s30, 4  ;;  %s3652_s18 = int_to_ptr.vmem [resolvable:$true] %s578_s18 }
  0x2b   : > { %s3649_s0 = scalar_lea.hbm %s4320_s6, %s3636_s20  ;;  %s3165_s13 = scalar_lea.hbm %s4320_s6, 32 }
  0x2c   : > { %s3160_s29 = scalar_lea.hbm %s3649_s0, 16  ;;  %p3166_p0 = scmp.lt.u32.totalorder %s3649_s0, %s4320_s6 }
  0x2d   : > { %p3161_p10 = scmp.ne.s32.totalorder %s3649_s0, %s3160_s29  ;;  %p3167_p1 = scmp.lt.u32.totalorder %s3165_s13, %s3160_s29 }
  0x2e   : > { %p3169_p3 = scmp.lt.u32.totalorder %s3160_s29, %s3649_s0 }
  0x2f   : > { %p3163_p12 = pnand %p3660_p11, %p3161_p10  ;;  %p3168_p2 = por %p3167_p1, %p3166_p0 }
  0x31   : > { %p3164_p13 = pneg %p3163_p12  ;;  %p3170_p4 = por %p3169_p3, %p3168_p2 }
  0x33   : > { %p3171_p5 = pnand %p3170_p4, %p3164_p13 }
  0x35   : > { %3174 = shalt.err (!%p3171_p5)
}
  0x36   : > { %s3175_s26 = scalar_lea.vmem %s3652_s18, 16  ;;  %s3482_s23 = smov [#allocation5]  }
  0x37   : > { %p3176_p6 = scmp.ne.s32.totalorder %s3652_s18, %s3175_s26  ;;  %s3180_s24 = sshll.u32 %s3482_s23, 4  ;;  %s3181_s24 = int_to_ptr.vmem [resolvable:$false] %s3180_s24 }
  0x38   : > { %s3182_s15 = scalar_lea.vmem %s3181_s24, 32  ;;  %p3183_p9 = scmp.lt.s32.totalorder %s3652_s18, %s3181_s24 }
  0x39   : > { %p3178_p10 = pnand %p3176_p6, %p3660_p11  ;;  %p3184_p7 = scmp.lt.s32.totalorder %s3182_s15, %s3175_s26 }
  0x3b   : > { %p3179_p12 = pneg %p3178_p10  ;;  %p3185_p0 = por %p3184_p7, %p3183_p9 }
  0x3d   : > { %p3186_p1 = pnand %p3185_p0, %p3179_p12 }
  0x3f   : > { %3189 = shalt.err (!%p3186_p1)
}
  0x40   : > { %s4322_s13 = scalar_lea.sflag [#allocation6], %s3643_s22  ;;  %p728_p13 = scmp.lt.s32.totalorder %s3480_s27, 3 }
  0x41   : > { %3023 = dma.hbm_to_vmem [thread:$0]  (!%p3638_p8), %s3649_s0, 16, %s3652_s18, %s4322_s13  }
  0x42   : > { %s4323_s9 = sld [smem:[#allocation32_spill]]  ;;  %p4324_p7 = scmp.ge.s32.totalorder %s3480_s27, 1 }
  0x43   : > { %s613_s24 = scalar_lea.vmem [#allocation8], %s3633_s1 }
  0x44   : > { %p3694_p9 = pnand %p4324_p7, %p728_p13  ;;  %s620_s15 = sshll.u32 %s613_s24, 4  ;;  %s621_s15 = int_to_ptr.vmem [resolvable:$true] %s620_s15 }
  0x46   : > { %s4325_s23 = scalar_select %p3694_p9, 1, 0 }
  0x48   : > { %s3690_s26 = scalar_lea.hbm %s4323_s9, %s3636_s20  ;;  %s3195_s29 = scalar_lea.hbm %s4323_s9, 32 }
  0x49   : > { %s3190_s18 = scalar_lea.hbm %s3690_s26, 16  ;;  %p3196_p5 = scmp.lt.u32.totalorder %s3690_s26, %s4323_s9 }
  0x4a   : > { %p3191_p2 = scmp.ne.s32.totalorder %s3690_s26, %s3190_s18  ;;  %p3197_p6 = scmp.lt.u32.totalorder %s3195_s29, %s3190_s18 }
  0x4b   : > { %p3199_p12 = scmp.lt.u32.totalorder %s3190_s18, %s3690_s26 }
  0x4c   : > { %p3193_p3 = pnand %p3191_p2, %p3660_p11  ;;  %p3198_p10 = por %p3197_p6, %p3196_p5 }
  0x4e   : > { %p3194_p4 = pneg %p3193_p3  ;;  %p3200_p0 = por %p3199_p12, %p3198_p10 }
  0x50   : > { %p3201_p1 = pnand %p3200_p0, %p3194_p4 }
  0x52   : > { %3204 = shalt.err (!%p3201_p1)
}
  0x53   : > { %s3205_s24 = scalar_lea.vmem %s621_s15, 16  ;;  %s3483_s6 = smov [#allocation8]  }
  0x54   : > { %p3206_p13 = scmp.ne.s32.totalorder %s621_s15, %s3205_s24  ;;  %s3210_s3 = sshll.u32 %s3483_s6, 4  ;;  %s3211_s3 = int_to_ptr.vmem [resolvable:$false] %s3210_s3 }
  0x55   : > { %s3212_s0 = scalar_lea.vmem %s3211_s3, 32  ;;  %p3213_p3 = scmp.lt.s32.totalorder %s621_s15, %s3211_s3 }
  0x56   : > { %p3208_p7 = pnand %p3206_p13, %p3660_p11  ;;  %p3214_p9 = scmp.lt.s32.totalorder %s3212_s0, %s3205_s24 }
  0x58   : > { %p3209_p2 = pneg %p3208_p7  ;;  %p3215_p8 = por %p3214_p9, %p3213_p3 }
  0x5a   : > { %p3216_p5 = pnand %p3215_p8, %p3209_p2 }
  0x5c   : > { %3219 = shalt.err (!%p3216_p5)
}
  0x5d   : > { %p4326_p6 = scmp.ne.s32.totalorder %s4319_s21, 0  ;;  %s4327_s7 = scalar_lea.sflag [#allocation9], %s3643_s22 }
  0x5e   : > { %s2709_s18 = sshll.u32 %s3633_s1, 4  ;;  %s2783_s13 = sshll.u32 %s3480_s27, 8 }
  0x5f   : > { %3029 = dma.hbm_to_vmem [thread:$0]  (!%p4326_p6), %s3690_s26, 16, %s621_s15, %s4327_s7  }
  0x60   : > { %s4328_s11 = sld [smem:[#allocation34_spill]]  ;;  %s648_s30 = scalar_lea.vmem [#allocation11], %s2709_s18 }
  0x61   : > { %s655_s24 = sshll.u32 %s648_s30, 4  ;;  %s4300_s0 = scalar_lea.sflag [#allocation12], %s3643_s22  ;;  %s3726_s24 = int_to_ptr.vmem [resolvable:$true] %s655_s24 }
  0x66   : > { %s3724_s3 = scalar_lea.hbm %s4328_s11, %s2783_s13  ;;  %s3225_s15 = scalar_lea.hbm %s4328_s11, 512 }
  0x67   : > { %s3220_s9 = scalar_lea.hbm %s3724_s3, 256  ;;  %p3226_p10 = scmp.lt.u32.totalorder %s3724_s3, %s4328_s11 }
  0x68   : > { %p3221_p8 = scmp.ne.s32.totalorder %s3724_s3, %s3220_s9  ;;  %p3227_p12 = scmp.lt.u32.totalorder %s3225_s15, %s3220_s9 }
  0x69   : > { %p3229_p1 = scmp.lt.u32.totalorder %s3220_s9, %s3724_s3 }
  0x6a   : > { %p3223_p9 = pnand %p3221_p8, %p3660_p11  ;;  %p3228_p0 = por %p3227_p12, %p3226_p10 }
  0x6c   : > { %p3224_p4 = pneg %p3223_p9  ;;  %p3230_p13 = por %p3229_p1, %p3228_p0 }
  0x6e   : > { %p3231_p7 = pnand %p3230_p13, %p3224_p4 }
  0x70   : > { %3234 = shalt.err (!%p3231_p7)
}
  0x71   : > { %s3235_s18 = scalar_lea.vmem %s3726_s24, 256  ;;  %s3484_s6 = smov [#allocation11]  }
  0x72   : > { %p3236_p2 = scmp.ne.s32.totalorder %s3726_s24, %s3235_s18  ;;  %s3240_s29 = sshll.u32 %s3484_s6, 4  ;;  %s3241_s29 = int_to_ptr.vmem [resolvable:$false] %s3240_s29 }
  0x73   : > { %s3242_s30 = scalar_lea.vmem %s3241_s29, 512  ;;  %p3243_p8 = scmp.lt.s32.totalorder %s3726_s24, %s3241_s29 }
  0x74   : > { %p3238_p3 = pnand %p3236_p2, %p3660_p11  ;;  %p3244_p9 = scmp.lt.s32.totalorder %s3242_s30, %s3235_s18 }
  0x76   : > { %p3239_p5 = pneg %p3238_p3  ;;  %p3245_p10 = por %p3244_p9, %p3243_p8 }
  0x78   : > { %p3246_p12 = pnand %p3245_p10, %p3239_p5 }
  0x7a   : > { %3249 = shalt.err (!%p3246_p12)
}
  0x7b   : > { %s3485_s9 = smov 64   ;;  %s3486_s27 = smov 4  }
  0x7c   : > { %3035 = dma.hbm_to_vmem [thread:$0]  (!%p4326_p6), %s3724_s3, 256, %s3726_s24, %s4300_s0, %s3485_s9, %s3485_s9, %s3486_s27  }
  0x7d   : > { %s3756_s7 = scalar_lea.hbm %s4286_s14, %s3636_s20  ;;  %s693_s13 = scalar_lea.vmem [#allocation14], %s3633_s1 }
  0x7e   : > { %s700_s18 = sshll.u32 %s693_s13, 4  ;;  %s4299_s6 = scalar_lea.sflag [#allocation15], %s3643_s22  ;;  %s701_s18 = int_to_ptr.vmem [resolvable:$true] %s700_s18 }
  0x7f   : > { %s3250_s29 = scalar_lea.hbm %s3756_s7, 16  ;;  %s3255_s24 = scalar_lea.hbm %s4286_s14, 32 }
  0x80   : > { %p3251_p4 = scmp.ne.s32.totalorder %s3756_s7, %s3250_s29  ;;  %p3256_p13 = scmp.lt.u32.totalorder %s3756_s7, %s4286_s14 }
  0x81   : > { %p3257_p7 = scmp.lt.u32.totalorder %s3255_s24, %s3250_s29  ;;  %p3259_p3 = scmp.lt.u32.totalorder %s3250_s29, %s3756_s7 }
  0x82   : > { %p3253_p0 = pnand %p3251_p4, %p3660_p11 }
  0x83   : > { %p3258_p2 = por %p3257_p7, %p3256_p13 }
  0x84   : > { %p3254_p1 = pneg %p3253_p0 }
  0x85   : > { %p3260_p5 = por %p3259_p3, %p3258_p2 }
  0x87   : > { %p3261_p8 = pnand %p3260_p5, %p3254_p1 }
  0x89   : > { %3264 = shalt.err (!%p3261_p8)
}
  0x8a   : > { %s3265_s26 = scalar_lea.vmem %s701_s18, 16  ;;  %s3487_s15 = smov [#allocation14]  }
  0x8b   : > { %p3266_p9 = scmp.ne.s32.totalorder %s701_s18, %s3265_s26  ;;  %s3270_s13 = sshll.u32 %s3487_s15, 4  ;;  %s3271_s13 = int_to_ptr.vmem [resolvable:$false] %s3270_s13 }
  0x8c   : > { %s3272_s30 = scalar_lea.vmem %s3271_s13, 32  ;;  %p3273_p4 = scmp.lt.s32.totalorder %s701_s18, %s3271_s13 }
  0x8d   : > { %p3268_p10 = pnand %p3266_p9, %p3660_p11  ;;  %p3274_p0 = scmp.lt.s32.totalorder %s3272_s30, %s3265_s26 }
  0x8f   : > { %p3269_p12 = pneg %p3268_p10  ;;  %p3275_p6 = por %p3274_p0, %p3273_p4 }
  0x91   : > { %p3276_p7 = pnand %p3275_p6, %p3269_p12 }
  0x93   : > { %3279 = shalt.err (!%p3276_p7)
}
  0x94   : > { %p4329_p13 = scmp.ne.s32.totalorder %s4319_s21, 0  ;;  %s4330_s5 = sld [smem:[#allocation28_spill]] }
  0x95   : > { %s554_s9 = scalar_lea.vmem [#allocation3], %s3633_s1  ;;  %s4331_s8 = sld [smem:[#allocation31_spill]] }
  0x96   : > { %3041 = dma.hbm_to_vmem [thread:$0]  (!%p4329_p13), %s3756_s7, 16, %s701_s18, %s4299_s6  }
  0x97   : > { %s561_s27 = sshll.u32 %s554_s9, 4  ;;  %s552_s30 = scalar_lea.sflag [#allocation4], %s3633_s1  ;;  %s3786_s27 = int_to_ptr.vmem [resolvable:$true] %s561_s27 }
  0x9a   : > { %s3783_s24 = scalar_lea.hbm %s4330_s5, %s3636_s20  ;;  %s3285_s3 = scalar_lea.hbm %s4330_s5, 32 }
  0x9b   : > { %s3792_s13 = scalar_lea.hbm %s4331_s8, %s3636_s20  ;;  %s3280_s7 = scalar_lea.hbm %s3783_s24, 16 }
  0x9c   : > { %p3281_p6 = scmp.ne.s32.totalorder %s3783_s24, %s3280_s7  ;;  %p3286_p3 = scmp.lt.u32.totalorder %s3783_s24, %s4330_s5 }
  0x9d   : > { %p3287_p5 = scmp.lt.u32.totalorder %s3285_s3, %s3280_s7  ;;  %p3289_p9 = scmp.lt.u32.totalorder %s3280_s7, %s3783_s24 }
  0x9e   : > { %p3283_p1 = pnand %p3281_p6, %p3660_p11 }
  0x9f   : > { %p3288_p8 = por %p3287_p5, %p3286_p3 }
  0xa0   : > { %p3284_p2 = pneg %p3283_p1 }
  0xa1   : > { %p3290_p10 = por %p3289_p9, %p3288_p8 }
  0xa3   : > { %p3291_p12 = pnand %p3290_p10, %p3284_p2 }
  0xa5   : > { %3294 = shalt.err (!%p3291_p12)
}
  0xa6   : > { %s3295_s9 = scalar_lea.vmem %s3786_s27, 16  ;;  %s3488_s26 = smov [#allocation3]  }
  0xa7   : > { %p3296_p4 = scmp.ne.s32.totalorder %s3786_s27, %s3295_s9  ;;  %s3300_s15 = sshll.u32 %s3488_s26, 4  ;;  %s3301_s15 = int_to_ptr.vmem [resolvable:$false] %s3300_s15 }
  0xa8   : > { %s3302_s0 = scalar_lea.vmem %s3301_s15, 32  ;;  %p3303_p6 = scmp.lt.s32.totalorder %s3786_s27, %s3301_s15 }
  0xa9   : > { %p3298_p0 = pnand %p3296_p4, %p3660_p11  ;;  %p3304_p1 = scmp.lt.s32.totalorder %s3302_s0, %s3295_s9 }
  0xab   : > { %p3299_p7 = pneg %p3298_p0  ;;  %p3305_p3 = por %p3304_p1, %p3303_p6 }
  0xad   : > { %p3306_p5 = pnand %p3305_p3, %p3299_p7 }
  0xaf   : > { %3309 = shalt.err (!%p3306_p5)
}
  0xb0   : > { %3020 = dma.hbm_to_vmem [thread:$0]  (!%p4329_p13), %s3783_s24, 16, %s3786_s27, %s552_s30  }
  0xb1   : > { %s596_s6 = scalar_lea.vmem [#allocation7], %s3633_s1  ;;  %s4332_s10 = sld [smem:[#allocation33_spill]] }
  0xb2   : > { %s603_s7 = sshll.u32 %s596_s6, 4  ;;  %s3310_s9 = scalar_lea.hbm %s3792_s13, 16  ;;  %s604_s7 = int_to_ptr.vmem [resolvable:$true] %s603_s7 }
  0xb3   : > { %p3311_p2 = scmp.ne.s32.totalorder %s3792_s13, %s3310_s9  ;;  %s3315_s0 = scalar_lea.hbm %s4331_s8, 32 }
  0xb4   : > { %p3316_p10 = scmp.lt.u32.totalorder %s3792_s13, %s4331_s8  ;;  %p3317_p12 = scmp.lt.u32.totalorder %s3315_s0, %s3310_s9 }
  0xb5   : > { %p3313_p8 = pnand %p3311_p2, %p3660_p11  ;;  %p3319_p0 = scmp.lt.u32.totalorder %s3310_s9, %s3792_s13 }
  0xb6   : > { %p3318_p4 = por %p3317_p12, %p3316_p10 }
  0xb7   : > { %s3821_s3 = scalar_lea.hbm %s4332_s10, %s3636_s20  ;;  %p3314_p9 = pneg %p3313_p8 }
  0xb8   : > { %p3320_p7 = por %p3319_p0, %p3318_p4 }
  0xba   : > { %p3321_p6 = pnand %p3320_p7, %p3314_p9 }
  0xbc   : > { %3324 = shalt.err (!%p3321_p6)
}
  0xbd   : > { %s3325_s24 = scalar_lea.vmem %s604_s7, 16  ;;  %s3489_s27 = smov [#allocation7]  }
  0xbe   : > { %p3326_p1 = scmp.ne.s32.totalorder %s604_s7, %s3325_s24  ;;  %s3330_s30 = sshll.u32 %s3489_s27, 4  ;;  %s3331_s30 = int_to_ptr.vmem [resolvable:$false] %s3330_s30 }
  0xbf   : > { %s3332_s6 = scalar_lea.vmem %s3331_s30, 32  ;;  %p3333_p2 = scmp.lt.s32.totalorder %s604_s7, %s3331_s30 }
  0xc0   : > { %p3328_p3 = pnand %p3326_p1, %p3660_p11  ;;  %p3334_p8 = scmp.lt.s32.totalorder %s3332_s6, %s3325_s24 }
  0xc2   : > { %p3329_p5 = pneg %p3328_p3  ;;  %p3335_p13 = por %p3334_p8, %p3333_p2 }
  0xc4   : > { %p3336_p10 = pnand %p3335_p13, %p3329_p5 }
  0xc6   : > { %3339 = shalt.err (!%p3336_p10)
}
  0xc7   : > { %p4333_p12 = scmp.ne.s32.totalorder %s4319_s21, 0  ;;  %s4334_s5 = scalar_lea.sflag [#allocation6], %s3643_s22 }
  0xc8   : > { %s630_s11 = scalar_lea.vmem [#allocation10], %s3633_s1  ;;  %s3847_s26 = scalar_lea.hbm %s4284_s12, %s3636_s20 }
  0xc9   : > { %3026 = dma.hbm_to_vmem [thread:$0]  (!%p4333_p12), %s3792_s13, 16, %s604_s7, %s4334_s5  }
  0xca   : > { %s637_s18 = sshll.u32 %s630_s11, 4  ;;  %s3340_s15 = scalar_lea.hbm %s3821_s3, 16  ;;  %s638_s18 = int_to_ptr.vmem [resolvable:$true] %s637_s18 }
  0xcb   : > { %p3341_p13 = scmp.ne.s32.totalorder %s3821_s3, %s3340_s15  ;;  %s3345_s27 = scalar_lea.hbm %s4332_s10, 32 }
  0xcc   : > { %p3346_p0 = scmp.lt.u32.totalorder %s3821_s3, %s4332_s10  ;;  %p3347_p7 = scmp.lt.u32.totalorder %s3345_s27, %s3340_s15 }
  0xcd   : > { %p3343_p9 = pnand %p3341_p13, %p3660_p11  ;;  %p3349_p1 = scmp.lt.u32.totalorder %s3340_s15, %s3821_s3 }
  0xce   : > { %p3348_p6 = por %p3347_p7, %p3346_p0 }
  0xcf   : > { %p3344_p4 = pneg %p3343_p9 }
  0xd0   : > { %p3350_p3 = por %p3349_p1, %p3348_p6 }
  0xd2   : > { %p3351_p5 = pnand %p3350_p3, %p3344_p4 }
  0xd4   : > { %3354 = shalt.err (!%p3351_p5)
}
  0xd5   : > { %s3355_s13 = scalar_lea.vmem %s638_s18, 16  ;;  %s3490_s7 = smov [#allocation10]  }
  0xd6   : > { %p3356_p2 = scmp.ne.s32.totalorder %s638_s18, %s3355_s13  ;;  %s3360_s5 = sshll.u32 %s3490_s7, 4  ;;  %s3361_s5 = int_to_ptr.vmem [resolvable:$false] %s3360_s5 }
  0xd7   : > { %s3362_s11 = scalar_lea.vmem %s3361_s5, 32  ;;  %p3363_p13 = scmp.lt.s32.totalorder %s638_s18, %s3361_s5 }
  0xd8   : > { %p3358_p8 = pnand %p3356_p2, %p3660_p11  ;;  %p3364_p9 = scmp.lt.s32.totalorder %s3362_s11, %s3355_s13 }
  0xda   : > { %p3359_p10 = pneg %p3358_p8  ;;  %p3365_p12 = por %p3364_p9, %p3363_p13 }
  0xdc   : > { %p3366_p0 = pnand %p3365_p12, %p3359_p10 }
  0xde   : > { %3369 = shalt.err (!%p3366_p0)
}
  0xdf   : > { %p4335_p7 = scmp.ne.s32.totalorder %s4319_s21, 0  ;;  %s4336_s29 = scalar_lea.sflag [#allocation9], %s3643_s22 }
  0xe0   : > { %s668_s9 = scalar_lea.vmem [#allocation13], %s3633_s1  ;;  %s3873_s27 = scalar_lea.hbm %s4288_s16, %s3636_s20 }
  0xe1   : > { %3032 = dma.hbm_to_vmem [thread:$0]  (!%p4335_p7), %s3821_s3, 16, %s638_s18, %s4336_s29  }
  0xe2   : > { %s675_s15 = sshll.u32 %s668_s9, 4  ;;  %s3370_s30 = scalar_lea.hbm %s3847_s26, 16  ;;  %s676_s15 = int_to_ptr.vmem [resolvable:$true] %s675_s15 }
  0xe3   : > { %p3371_p12 = scmp.ne.s32.totalorder %s3847_s26, %s3370_s30  ;;  %s3375_s7 = scalar_lea.hbm %s4284_s12, 32 }
  0xe4   : > { %p3376_p1 = scmp.lt.u32.totalorder %s3847_s26, %s4284_s12  ;;  %p3377_p3 = scmp.lt.u32.totalorder %s3375_s7, %s3370_s30 }
  0xe5   : > { %p3373_p4 = pnand %p3371_p12, %p3660_p11  ;;  %p3379_p2 = scmp.lt.u32.totalorder %s3370_s30, %s3847_s26 }
  0xe6   : > { %p3378_p5 = por %p3377_p3, %p3376_p1 }
  0xe7   : > { %p3374_p6 = pneg %p3373_p4 }
  0xe8   : > { %p3380_p8 = por %p3379_p2, %p3378_p5 }
  0xea   : > { %p3381_p10 = pnand %p3380_p8, %p3374_p6 }
  0xec   : > { %3384 = shalt.err (!%p3381_p10)
}
  0xed   : > { %s3385_s20 = scalar_lea.vmem %s676_s15, 16  ;;  %s3491_s3 = smov [#allocation13]  }
  0xee   : > { %p3386_p13 = scmp.ne.s32.totalorder %s676_s15, %s3385_s20  ;;  %s3390_s18 = sshll.u32 %s3491_s3, 4  ;;  %s3391_s18 = int_to_ptr.vmem [resolvable:$false] %s3390_s18 }
  0xef   : > { %s3392_s29 = scalar_lea.vmem %s3391_s18, 32  ;;  %p3393_p12 = scmp.lt.s32.totalorder %s676_s15, %s3391_s18 }
  0xf0   : > { %p3388_p9 = pnand %p3386_p13, %p3660_p11  ;;  %p3394_p4 = scmp.lt.s32.totalorder %s3392_s29, %s3385_s20 }
  0xf2   : > { %p3389_p0 = pneg %p3388_p9  ;;  %p3395_p7 = por %p3394_p4, %p3393_p12 }
  0xf4   : > { %p3396_p1 = pnand %p3395_p7, %p3389_p0 }
  0xf6   : > { %3399 = shalt.err (!%p3396_p1)
}
  0xf7   : > { %p4337_p3 = scmp.ne.s32.totalorder %s4319_s21, 0  ;;  %s4338_s9 = scalar_lea.sflag [#allocation12], %s3643_s22 }
  0xf8   : > { %s716_s0 = scalar_lea.vmem [#allocation16], %s3633_s1  ;;  %s3400_s30 = scalar_lea.hbm %s3873_s27, 16 }
  0xf9   : > { %3038 = dma.hbm_to_vmem [thread:$0]  (!%p4337_p3), %s3847_s26, 16, %s676_s15, %s4338_s9  }
  0xfa   : > { %s723_s24 = sshll.u32 %s716_s0, 4  ;;  %p3401_p6 = scmp.ne.s32.totalorder %s3873_s27, %s3400_s30  ;;  %s724_s24 = int_to_ptr.vmem [resolvable:$true] %s723_s24 }
  0xfb   : > { %s3405_s7 = scalar_lea.hbm %s4288_s16, 32  ;;  %p3406_p2 = scmp.lt.u32.totalorder %s3873_s27, %s4288_s16 }
  0xfc   : > { %p3403_p7 = pnand %p3401_p6, %p3660_p11  ;;  %p3407_p8 = scmp.lt.u32.totalorder %s3405_s7, %s3400_s30 }
  0xfd   : > { %p3409_p13 = scmp.lt.u32.totalorder %s3400_s30, %s3873_s27 }
  0xfe   : > { %p3404_p5 = pneg %p3403_p7  ;;  %p3408_p10 = por %p3407_p8, %p3406_p2 }
 0x100   : > { %p3410_p9 = por %p3409_p13, %p3408_p10 }
 0x102   : > { %p3411_p0 = pnand %p3410_p9, %p3404_p5 }
 0x104   : > { %3414 = shalt.err (!%p3411_p0)
}
 0x105   : > { %s3415_s1 = scalar_lea.vmem %s724_s24, 16  ;;  %s3492_s26 = smov [#allocation16]  }
 0x106   : > { %p3416_p12 = scmp.ne.s32.totalorder %s724_s24, %s3415_s1  ;;  %s3420_s15 = sshll.u32 %s3492_s26, 4  ;;  %s3421_s15 = int_to_ptr.vmem [resolvable:$false] %s3420_s15 }
 0x107   : > { %s3422_s20 = scalar_lea.vmem %s3421_s15, 32  ;;  %p3423_p6 = scmp.lt.s32.totalorder %s724_s24, %s3421_s15 }
 0x108   : > { %p3418_p4 = pnand %p3416_p12, %p3660_p11  ;;  %p3424_p7 = scmp.lt.s32.totalorder %s3422_s20, %s3415_s1 }
 0x10a   : > { %p3419_p1 = pneg %p3418_p4  ;;  %p3425_p3 = por %p3424_p7, %p3423_p6 }
 0x10c   : > { %p3426_p2 = pnand %p3425_p3, %p3419_p1 }
 0x10e   : > { %3429 = shalt.err (!%p3426_p2)
}
 0x10f   : > { %p4339_p8 = scmp.ne.s32.totalorder %s4319_s21, 0  ;;  %s4340_s3 = scalar_lea.sflag [#allocation15], %s3643_s22 }
 0x110   : > { %p4341_p5 = scmp.ne.s32.totalorder %s4325_s23, 0 }
 0x111   : > { %3044 = dma.hbm_to_vmem [thread:$0]  (!%p4339_p8), %s3873_s27, 16, %s724_s24, %s4340_s3  }
 0x112   : > { %732 = sbr.rel (%p4341_p5) target bundleno = 4542 (0x11be), region = 88  ;;  %s3917_s17 = sand.u32 (!%p4341_p5), 1, %s3472_s25  }
 0x113   : > { %s735_s18 = scalar_lea.sflag (!%p4341_p5), [#allocation4], %s3917_s17  ;;  %p4342_p11 = scmp.ne.s32.totalorder (!%p4341_p5), %s4318_s19, 0 }
 0x119   : > { %3447 = dma.done.wait (%p4342_p11), %s735_s18, 16  }
 0x11a   : > { %3449 = vsyncadd (%p4342_p11), %s735_s18, 4294967280  ;;  %s742_s21 = sand.u32 1, %s3611_s28  }
 0x11b   : > { %s743_s22 = scalar_lea.sflag [#allocation6], %s742_s21 }
 0x11c   : > { %3451 = dma.done.wait (%p4342_p11), %s743_s22, 32  }
 0x11d   : > { %3453 = vsyncadd (%p4342_p11), %s743_s22, 4294967264  ;;  %s759_s9 = scalar_lea.sflag [#allocation9], %s742_s21 }
 0x11e   : > { %3455 = dma.done.wait (%p4342_p11), %s759_s9, 32  }
 0x11f   : > { %3457 = vsyncadd (%p4342_p11), %s759_s9, 4294967264  ;;  %s2716_s24 = sshll.u32 %s3917_s17, 4  ;;  %s775_s6 = scalar_lea.sflag [#allocation12], %s742_s21 }
 0x120   : > { %s3939_s13 = scalar_lea.vmem [#allocation11], %s2716_s24 }
 0x121   : > { %3459 = dma.done.wait (%p4342_p11), %s775_s6, 272  }
 0x122   : > { %3461 = vsyncadd (%p4342_p11), %s775_s6, 4294967024  ;;  %s792_s5 = scalar_lea.sflag [#allocation15], %s742_s21 }
 0x123   : > { %3463 = dma.done.wait (%p4342_p11), %s792_s5, 32  }
 0x124   : > { %3465 = vsyncadd (%p4342_p11), %s792_s5, 4294967264  ;;  %p911_p3 = scmp.lt.s32.totalorder %s3611_s28, 1  ;;  %s4343_s22 = sld [smem:[#allocation26_spill]] }
 0x125   : > { %s4344_s7 = sld [smem:[#allocation27_spill]]  ;;  %s4345_s23 = sld [smem:[#allocation30_spill]] }
 0x126   : > { %s3953_s1 = scalar_select %p911_p3, %s3611_s28, 1 }
 0x127   : > { %s4346_s8 = sld [smem:[#allocation36_spill]]  ;;  %s4347_s10 = sld [smem:[#allocation35_spill]] }
 0x128   : > { %s2784_s26 = sshll.u32 %s3953_s1, 4  ;;  %s2788_s15 = sshll.u32 %s3953_s1, 5 }
 0x129   : > { %s920_s6 = scalar_lea.vmem %s4274_s2, %s2784_s26  ;;  %s802_s24 = scalar_lea.vmem [#allocation16], %s3917_s17 }
 0x12a   : > { %s915_s19 = scalar_lea.vmem %s4343_s22, %s2784_s26  ;;  %p2727_p10 = scmp.ne.s32.totalorder %s3611_s28, 0 }
 0x12b   : > { %s3969_s30 = scalar_lea.vmem %s4344_s7, %s2784_s26  ;;  %s3974_s29 = scalar_lea.vmem %s4345_s23, %s2784_s26  ;;  %vm949_vm0 = vcmask (!%p2727_p10), 261120  }
 0x12c   : > { %946 = sbr.rel (%p2727_p10) target bundleno = 308 (0x134), region = 128  ;;  %s4348_s5 = sld [smem:[#allocation25_spill]] (!%p2727_p10) }
 0x12d   : > { %s941_s18 = scalar_lea.vmem %s4346_s8, %s3953_s1  ;;  %s3984_s9 = scalar_lea.vmem %s4347_s10, %s2788_s15 }
 0x132   : > { %v947_v0 = vld [vmem:[%s4348_s5] sm:$0xff] (!%p2727_p10)  ;;  %v948_v1 = vld [vmem:[%s4348_s5 + $0x8] sm:$0xff] (!%p2727_p10) }
 0x133   : > { %950 = vst.msk [vmem:[#allocation2] sm:$0xff] %vm949_vm0, %v947_v0  ;;  %951 = vst.msk [vmem:[#allocation2 + $0x8] sm:$0xff] %vm949_vm0, %v948_v1 }
 0x134 PF: > { %v3104_v2 = vld [vmem:[%s920_s6] sm:$0xff]   ;;  %v3493_v3 = vmov 0.0   ;;  %v3105_v4 = vld [vmem:[%s920_s6 + $0x8] sm:$0xff]   ;;  %vm3494_vm1 = vmmov 0   ;;  %vm978_vm2 = vcmask 261120   ;;  %s4349_s8 = scalar_lea.vmem [#allocation3], %s3917_s17 }
 0x135   : > { %2855 = vmatprep.subr.bf16.mxu1 %v3493_v3  ;;  %2847 = vmatprep.subr.bf16.mxu0 %v3493_v3  ;;  %v3106_v5 = vld [vmem:[%s915_s19] sm:$0xff]   ;;  %v3107_v8 = vld [vmem:[%s915_s19 + $0x8] sm:$0xff]   ;;  %vm1169_vm3 = vcmask 64512   ;;  %s3495_s26 = smov 120   ;;  %s4351_s3 = scalar_lea.vmem [#allocation5], %s3917_s17  ;;  %vm1291_vm4 = vcmask 1043456  }
 0x136   : > { %2856 = vmatpush3.bf16.msra.mxu1 %v3104_v2  ;;  %2859 = vmatprep.mubr.msk.bf16.mxu1 %vm3494_vm1, %v3493_v3  ;;  %v3108_v10 = vld [vmem:[%s3969_s30] sm:$0xff]   ;;  %v3109_v11 = vld [vmem:[%s3969_s30 + $0x8] sm:$0xff]   ;;  %s4350_s30 = scalar_lea.vmem %s4276_s4, %s3953_s1  ;;  %s3496_s19 = smov 112   ;;  %vm2073_vm5 = vcmask 130048   ;;  %vm2076_vm6 = vcmask 195584   ;;  %vm2304_vm7 = vcmask 523264  }
 0x137   : > { %2857 = vmatprep.subr.bf16.mxu1 %v3493_v3  ;;  %2851 = vmatprep.mubr.msk.bf16.mxu0 %vm3494_vm1, %v3493_v3  ;;  %v2732_v12 = vld [vmem:[%s4349_s8] ss:$0 sm:$0xff]  ;;  %s3497_s6 = smov 104   ;;  %s3498_s15 = smov 8  }
 0x138   : > { %2848 = vmatpush3.bf16.msra.mxu0 %v3106_v5  ;;  %v2728_v17 = vld [vmem:[%s4350_s30] ss:$0 sm:$0xff]  ;;  %s3499_s20 = smov 16   ;;  %s3500_s21 = smov 24  }
 0x139   : > { %2849 = vmatprep.subr.bf16.mxu0 %v3493_v3  ;;  %v2736_v36 = vld [vmem:[%s4351_s3] ss:$0 sm:$0xff]  ;;  %s4354_s22 = scalar_lea.vmem [#allocation10], %s3917_s17  ;;  %s4355_s7 = scalar_lea.vmem [#allocation13], %s3917_s17 }
 0x13a   : > { %v3999_v6 = vld [vmem:[#allocation2] sm:$0xff]  ;;  %v4001_v7 = vld [vmem:[#allocation2 + $0x8] sm:$0xff]  ;;  %2858 = vmatpush3.bf16.msra.mxu1 %v3105_v4  ;;  %s4356_s11 = scalar_lea.vmem [#allocation14], %s3917_s17  ;;  %p2780_p13 = scmp.ne.s32.totalorder %s3611_s28, 1 }
 0x13b   : > { %v954_v9 = vpack.c.bf16 %v4001_v7, %v3999_v6  ;;  %2871 = vmatprep.subr.bf16.mxu1 %v3493_v3  ;;  %s4358_s0 = sld [smem:[#allocation37_spill]] (!%p2780_p13) }
 0x13c   : > { %2850 = vmatpush3.bf16.msra.mxu0 %v3107_v8 }
 0x13d   : > { %2860 = vmatmul.mubr.msk.bf16.vlgmr.msra.gmra.mrb[0].mxu1 %vm978_vm2, %v954_v9  ;;  %2863 = vmatprep.subr.bf16.mxu0 %v3493_v3 }
 0x13e   : > { %2873 = vmatprep.mubr.msk.bf16.mxu1 %vm3494_vm1, %v3493_v3 }
 0x13f   : > { %2852 = vmatmul.mubr.msk.bf16.vlgmr.msra.gmra.mrb[0].mxu0 %vm978_vm2, %v954_v9 }
 0x140   : > { %2864 = vmatpush3.bf16.msra.mxu0 %v3108_v10  ;;  %2867 = vmatprep.mubr.msk.bf16.mxu0 %vm3494_vm1, %v3493_v3 }
 0x141   : > { %2865 = vmatprep.subr.bf16.mxu0 %v3493_v3 }
 0x144   : > { %2866 = vmatpush3.bf16.msra.mxu0 %v3109_v11 }
 0x145   : > { %2877 = vmatprep.subr.bf16.mxu0 %v3493_v3 }
 0x147   : > { %2868 = vmatmul.mubr.msk.bf16.vlgmr.msra.gmra.mrb[4].mxu0 %vm978_vm2, %v954_v9 }
 0x148   : > { %2879 = vmatprep.mubr.msk.bf16.mxu0 %vm3494_vm1, %v3493_v3 }
 0x210   : > { %v1080_v13 = vpop.f32.mrb[0].mxu1 }
 0x211   : > { %v1081_v14 = vadd.f32 %v2732_v12, %v1080_v13  ;;  %v2861_v15 = vpop.f32.mrb[1].mxu1 }
 0x212   : > { %v1083_v16 = vpop.f32.mrb[2].mxu1  ;;  %v1016_v18 = vpop.f32.mrb[0].mxu0 }
 0x213   : > { %v4030_v19 = vpack.c.bf16 %v1081_v14, %v1081_v14  ;;  %v1084_v20 = vadd.f32 %v2732_v12, %v1083_v16  ;;  %v2862_v21 = vpop.f32.mrb[3].mxu1  ;;  %v2853_v22 = vpop.f32.mrb[1].mxu0  ;;  %v1017_v25 = vadd.f32 %v2728_v17, %v1016_v18 }
 0x214   : > { %v1019_v23 = vpop.f32.mrb[2].mxu0 }
 0x215   : > { %v4032_v24 = vpack.c.bf16 %v1084_v20, %v1084_v20  ;;  %v1174_v26 = vsel %vm1169_vm3, %v4030_v19, 0  ;;  %v2854_v27 = vpop.f32.mrb[3].mxu0  ;;  %v4041_v29 = vpack.c.bf16 %v1017_v25, %v1017_v25  ;;  %v1020_v30 = vadd.f32 %v2728_v17, %v1019_v23 }
 0x216   : > { %2872 = vmatpush3.bf16.xpose.msra.mxu1 %v1174_v26 }
 0x217   : > { %1433 = vrot.lane.b32.xlu1 %v4032_v24, %s3495_s26  ;;  %v1220_v28 = vsel %vm1169_vm3, %v4032_v24, 0  ;;  %2883 = vmatprep.subr.bf16.mxu1 %v3493_v3  ;;  %v4044_v34 = vpack.c.bf16 %v1020_v30, %v1020_v30 }
 0x218   : > { %2878 = vmatpush3.bf16.xpose.msra.mxu0 %v1220_v28 }
 0x219   : > { %2889 = vmatprep.subr.bf16.mxu0 %v3493_v3 }
 0x21a   : > { %v1144_v31 = vpop.f32.mrb[4].mxu0 }
 0x21b   : > { %v2869_v32 = vpop.f32.mrb[5].mxu0  ;;  %v1145_v37 = vadd.f32 %v2736_v36, %v1144_v31 }
 0x21c   : > { %v1147_v33 = vpop.f32.mrb[6].mxu0 }
 0x21d   : > { %2874 = vmatmul.mubr.msk.bf16.vlgmr.msra.gmra.mrb[4].mxu1 %vm1169_vm3, %v4041_v29  ;;  %v2870_v35 = vpop.f32.mrb[7].mxu0  ;;  %v1148_v38 = vadd.f32 %v2736_v36, %v1147_v33  ;;  %v4056_v39 = vpack.c.bf16 %v1145_v37, %v1145_v37 }
 0x21e   : > { %2885 = vmatprep.mubr.msk.bf16.mxu1 %vm3494_vm1, %v3493_v3 }
 0x21f   : > { %2880 = vmatmul.mubr.msk.bf16.vlgmr.msra.gmra.mrb[8].mxu0 %vm1169_vm3, %v4044_v34  ;;  %v4058_v40 = vpack.c.bf16 %v1148_v38, %v1148_v38  ;;  %v1293_v41 = vsel %vm1291_vm4, %v4056_v39, 0 }
 0x220   : > { %2891 = vmatprep.mubr.msk.bf16.mxu0 %vm3494_vm1, %v3493_v3  ;;  %2884 = vmatpush3.bf16.msra.mxu1 %v1293_v41 }
 0x221   : > { %v1339_v42 = vsel %vm1291_vm4, %v4058_v40, 0  ;;  %2895 = vmatprep.subr.bf16.mxu1 %v3493_v3 }
 0x222   : > { %2890 = vmatpush3.bf16.msra.mxu0 %v1339_v42 }
 0x223   : > { %2901 = vmatprep.subr.bf16.mxu0 %v3493_v3 }
 0x289   : > { %v1434_v1 = vpop.permute.xlu1 %1433 }
 0x28a   : > { %v1439_v15 = vsel %vm1169_vm3, %v1434_v1, 0 }
 0x2f0   : > { %v1210_v43 = vpop.f32.mrb[4].mxu1 }
 0x2f1   : > { %v1262_v44 = vmul.f32 0.35355338, %v1210_v43  ;;  %v2875_v45 = vpop.f32.mrb[5].mxu1 }
 0x2f2   : > { %v1213_v46 = vpop.f32.mrb[6].mxu1  ;;  %v1256_v47 = vpop.f32.mrb[8].mxu0 }
 0x2f3   : > { %v1263_v48 = vmul.f32 0.35355338, %v1256_v47  ;;  %v2876_v49 = vpop.f32.mrb[7].mxu1  ;;  %v2881_v50 = vpop.f32.mrb[9].mxu0  ;;  %v1264_v51 = vsel %vm1169_vm3, %v1262_v44, -inf }
 0x2f4   : > { %1265 = vmax.xlane.f32.xlu0 %v1264_v51  ;;  %v1259_v52 = vpop.f32.mrb[10].mxu0 }
 0x2f5   : > { %v2882_v53 = vpop.f32.mrb[11].mxu0  ;;  %v1267_v54 = vsel %vm1169_vm3, %v1263_v48, -inf }
 0x2f8   : > { %1268 = vmax.xlane.f32.xlu0 %v1267_v54 }
 0x30e   : > { %1383 = vrot.lane.b32.xlu0 %v4030_v19, %s3495_s26 }
 0x381   : > { %v1266_v55 = vpop.xlane.xlu0 %1265 }
 0x382   : > { %v1270_v56 = vsub.f32 %v1262_v44, %v1266_v55 }
 0x384   : > { %v1272_v57 = vmul.f32 1.442695, %v1270_v56 }
 0x385   : > { %v1269_v58 = vpop.xlane.xlu0 %1268 }
 0x386   : > { %3118 = vpow2.f32 %v1272_v57  ;;  %v1271_v59 = vsub.f32 %v1263_v48, %v1269_v58 }
 0x388   : > { %v1274_v60 = vmul.f32 1.442695, %v1271_v59 }
 0x389   : > { %v1384_v9 = vpop.permute.xlu0 %1383 }
 0x38a   : > { %3120 = vpow2.f32 %v1274_v60  ;;  %v1389_v12 = vsel %vm1169_vm3, %v1384_v9, 0 }
 0x390   : > { %v3119_v61 = vpop.eup %3118 }
 0x391   : > { %v1276_v62 = vsel %vm1169_vm3, %v3119_v61, 0.0 }
 0x392   : > { %1277 = vadd.xlane.f32.xlu1 %v1276_v62 }
 0x394   : > { %v3121_v63 = vpop.eup %3120 }
 0x395   : > { %v1279_v0 = vsel %vm1169_vm3, %v3121_v63, 0.0 }
 0x396   : > { %1280 = vadd.xlane.f32.xlu1 %v1279_v0 }
 0x3a7   : > { %1381 = vrot.lane.b32.xlu1 %v4041_v29, %s3495_s26 }
 0x3ab   : > { %1431 = vrot.lane.b32.xlu1 %v4044_v34, %s3495_s26 }
 0x41f   : > { %v1278_v2 = vpop.xlane.xlu1 %1277 }
 0x420   : > { %3122 = vrcp.f32 %v1278_v2 }
 0x423   : > { %v1281_v4 = vpop.xlane.xlu1 %1280 }
 0x424   : > { %3124 = vrcp.f32 %v1281_v4 }
 0x427   : > { %v1382_v16 = vpop.permute.xlu1 %1381 }
 0x42a   : > { %v3123_v5 = vpop.eup %3122 }
 0x42b   : > { %v1284_v8 = vmul.f32 %v3123_v5, %v3119_v61  ;;  %v1432_v17 = vpop.permute.xlu1 %1431 }
 0x42d   : > { %v1286_v10 = vpack.c.bf16 %v1284_v8, %v1284_v8 }
 0x42e   : > { %v3125_v11 = vpop.eup %3124 }
 0x42f   : > { %v1285_v13 = vmul.f32 %v3125_v11, %v3121_v63  ;;  %2886 = vmatmul.mubr.msk.bf16.vlgmr.msra.gmra.mrb[8].mxu1 %vm1169_vm3, %v1286_v10 }
 0x430   : > { %2896 = vmatpush3.bf16.xpose.msra.mxu1 %v1389_v12  ;;  %2897 = vmatprep.mubr.msk.bf16.mxu1 %vm3494_vm1, %v3493_v3 }
 0x431   : > { %v1287_v14 = vpack.c.bf16 %v1285_v13, %v1285_v13  ;;  %2907 = vmatprep.subr.bf16.mxu1 %v3493_v3 }
 0x433   : > { %2892 = vmatmul.mubr.msk.bf16.vlgmr.msra.gmra.mrb[12].mxu0 %vm1169_vm3, %v1287_v14 }
 0x434   : > { %2902 = vmatpush3.bf16.xpose.msra.mxu0 %v1439_v15  ;;  %2903 = vmatprep.mubr.msk.bf16.mxu0 %vm3494_vm1, %v3493_v3 }
 0x435   : > { %2913 = vmatprep.subr.bf16.mxu0 %v3493_v3 }
 0x437   : > { %2898 = vmatmul.mubr.msk.bf16.vlgmr.msra.gmra.mrb[12].mxu1 %vm1169_vm3, %v1382_v16 }
 0x438   : > { %2909 = vmatprep.mubr.msk.bf16.mxu1 %vm3494_vm1, %v3493_v3 }
 0x43b   : > { %2904 = vmatmul.mubr.msk.bf16.vlgmr.msra.gmra.mrb[16].mxu0 %vm1169_vm3, %v1432_v17 }
 0x43c   : > { %2915 = vmatprep.mubr.msk.bf16.mxu0 %vm3494_vm1, %v3493_v3 }
 0x502   : > { %v4092_v18 = vpop.f32.mrb[8].mxu1 }
 0x503   : > { %v2887_v20 = vpop.f32.mrb[9].mxu1 }
 0x504   : > { %v1332_v21 = vpop.f32.mrb[10].mxu1 }
 0x505   : > { %v2888_v22 = vpop.f32.mrb[11].mxu1 }
 0x506   : > { %v4094_v23 = vpop.f32.mrb[12].mxu0 }
 0x507   : > { %v2893_v25 = vpop.f32.mrb[13].mxu0 }
 0x508   : > { %v1378_v26 = vpop.f32.mrb[14].mxu0 }
 0x509   : > { %v2894_v27 = vpop.f32.mrb[15].mxu0 }
 0x50a   : > { %v1425_v28 = vpop.f32.mrb[12].mxu1 }
 0x50b   : > { %v1481_v30 = vmul.f32 0.35355338, %v1425_v28  ;;  %v2899_v31 = vpop.f32.mrb[13].mxu1 }
 0x50c   : > { %v1428_v32 = vpop.f32.mrb[14].mxu1 }
 0x50d   : > { %v2900_v33 = vpop.f32.mrb[15].mxu1  ;;  %v1483_v35 = vsel %vm1169_vm3, %v1481_v30, -inf }
 0x50e   : > { %1484 = vmax.xlane.f32.xlu0 %v1483_v35  ;;  %v1475_v36 = vpop.f32.mrb[16].mxu0 }
 0x50f   : > { %v1482_v37 = vmul.f32 0.35355338, %v1475_v36  ;;  %v2905_v38 = vpop.f32.mrb[17].mxu0 }
 0x510   : > { %v1478_v41 = vpop.f32.mrb[18].mxu0 }
 0x511   : > { %v2906_v42 = vpop.f32.mrb[19].mxu0  ;;  %v1486_v43 = vsel %vm1169_vm3, %v1482_v37, -inf }
 0x512   : > { %1487 = vmax.xlane.f32.xlu1 %v1486_v43 }
 0x523   : > { %1555 = vrot.lane.b32.xlu1 %v4058_v40, %s3495_s26 }
 0x527   : > { %1605 = vrot.lane.b32.xlu1 %v4030_v19, %s3496_s19 }
 0x52b   : > { %1655 = vrot.lane.b32.xlu1 %v4032_v24, %s3496_s19 }
 0x52f   : > { %1653 = vrot.lane.b32.xlu1 %v4044_v34, %s3496_s19 }
 0x59b   : > { %v1485_v44 = vpop.xlane.xlu0 %1484 }
 0x59c   : > { %v1489_v45 = vsub.f32 %v1481_v30, %v1485_v44 }
 0x59e   : > { %v1491_v46 = vmul.f32 1.442695, %v1489_v45 }
 0x59f   : > { %v1488_v47 = vpop.xlane.xlu1 %1487 }
 0x5a0   : > { %3126 = vpow2.f32 %v1491_v46  ;;  %v1490_v48 = vsub.f32 %v1482_v37, %v1488_v47 }
 0x5a2   : > { %v1493_v49 = vmul.f32 1.442695, %v1490_v48 }
 0x5a3   : > { %v1556_v50 = vpop.permute.xlu1 %1555 }
 0x5a4   : > { %3128 = vpow2.f32 %v1493_v49  ;;  %v1561_v51 = vsel %vm1291_vm4, %v1556_v50, 0 }
 0x5a5   : > { %2914 = vmatpush3.bf16.msra.mxu0 %v1561_v51 }
 0x5a6   : > { %2925 = vmatprep.subr.bf16.mxu0 %v3493_v3 }
 0x5a7   : > { %v1606_v61 = vpop.permute.xlu1 %1605 }
 0x5a8   : > { %v1611_v4 = vsel %vm1169_vm3, %v1606_v61, 0 }
 0x5aa   : > { %v3127_v52 = vpop.eup %3126 }
 0x5ab   : > { %v1495_v53 = vsel %vm1169_vm3, %v3127_v52, 0.0  ;;  %v1656_v2 = vpop.permute.xlu1 %1655 }
 0x5ac   : > { %1496 = vadd.xlane.f32.xlu0 %v1495_v53  ;;  %v1661_v8 = vsel %vm1169_vm3, %v1656_v2, 0 }
 0x5ae   : > { %v3129_v54 = vpop.eup %3128 }
 0x5af   : > { %v1498_v55 = vsel %vm1169_vm3, %v3129_v54, 0.0  ;;  %v1654_v10 = vpop.permute.xlu1 %1653 }
 0x5b0   : > { %1499 = vadd.xlane.f32.xlu0 %v1498_v55 }
 0x5c6   : > { %1507 = vrot.lane.b32.xlu0 %v4056_v39, %s3495_s26 }
 0x5ca   : > { %1603 = vrot.lane.b32.xlu0 %v4041_v29, %s3496_s19 }
 0x639   : > { %v1497_v56 = vpop.xlane.xlu0 %1496 }
 0x63a   : > { %3130 = vrcp.f32 %v1497_v56 }
 0x63d   : > { %v1500_v57 = vpop.xlane.xlu0 %1499 }
 0x63e   : > { %3132 = vrcp.f32 %v1500_v57 }
 0x641   : > { %v1508_v58 = vpop.permute.xlu0 %1507 }
 0x642   : > { %v1513_v59 = vsel %vm1291_vm4, %v1508_v58, 0 }
 0x643   : > { %2908 = vmatpush3.bf16.msra.mxu1 %v1513_v59 }
 0x644   : > { %v3131_v60 = vpop.eup %3130  ;;  %2919 = vmatprep.subr.bf16.mxu1 %v3493_v3 }
 0x645   : > { %v1503_v62 = vmul.f32 %v3131_v60, %v3127_v52  ;;  %v1604_v9 = vpop.permute.xlu0 %1603 }
 0x647   : > { %v1505_v63 = vpack.c.bf16 %v1503_v62, %v1503_v62 }
 0x648   : > { %v3133_v0 = vpop.eup %3132 }
 0x649   : > { %v1504_v1 = vmul.f32 %v3133_v0, %v3129_v54  ;;  %2910 = vmatmul.mubr.msk.bf16.vlgmr.msra.gmra.mrb[16].mxu1 %vm1169_vm3, %v1505_v63 }
 0x64a   : > { %2921 = vmatprep.mubr.msk.bf16.mxu1 %vm3494_vm1, %v3493_v3 }
 0x64b   : > { %v1506_v5 = vpack.c.bf16 %v1504_v1, %v1504_v1 }
 0x64c   : > { %2920 = vmatpush3.bf16.xpose.msra.mxu1 %v1611_v4 }
 0x64d   : > { %2916 = vmatmul.mubr.msk.bf16.vlgmr.msra.gmra.mrb[20].mxu0 %vm1169_vm3, %v1506_v5  ;;  %2931 = vmatprep.subr.bf16.mxu1 %v3493_v3 }
 0x64e   : > { %2926 = vmatpush3.bf16.xpose.msra.mxu0 %v1661_v8  ;;  %2927 = vmatprep.mubr.msk.bf16.mxu0 %vm3494_vm1, %v3493_v3 }
 0x64f   : > { %2937 = vmatprep.subr.bf16.mxu0 %v3493_v3 }
 0x653   : > { %2922 = vmatmul.mubr.msk.bf16.vlgmr.msra.gmra.mrb[20].mxu1 %vm1169_vm3, %v1604_v9 }
 0x654   : > { %2933 = vmatprep.mubr.msk.bf16.mxu1 %vm3494_vm1, %v3493_v3 }
 0x655   : > { %2928 = vmatmul.mubr.msk.bf16.vlgmr.msra.gmra.mrb[24].mxu0 %vm1169_vm3, %v1654_v10 }
 0x656   : > { %2939 = vmatprep.mubr.msk.bf16.mxu0 %vm3494_vm1, %v3493_v3 }
 0x71c   : > { %v4132_v11 = vpop.f32.mrb[16].mxu1 }
 0x71d   : > { %v2911_v12 = vpop.f32.mrb[17].mxu1 }
 0x71e   : > { %v1552_v13 = vpop.f32.mrb[18].mxu1 }
 0x71f   : > { %v2912_v14 = vpop.f32.mrb[19].mxu1 }
 0x720   : > { %v4134_v15 = vpop.f32.mrb[20].mxu0 }
 0x721   : > { %v3089_v16 = vpack.i.bf16 %v4134_v15, %v4132_v11  ;;  %v2917_v17 = vpop.f32.mrb[21].mxu0 }
 0x722   : > { %v1600_v20 = vpop.f32.mrb[22].mxu0 }
 0x723   : > { %v2918_v21 = vpop.f32.mrb[23].mxu0 }
 0x726   : > { %v1647_v22 = vpop.f32.mrb[20].mxu1 }
 0x727   : > { %v1703_v25 = vmul.f32 0.35355338, %v1647_v22  ;;  %v2923_v26 = vpop.f32.mrb[21].mxu1 }
 0x728   : > { %v1650_v27 = vpop.f32.mrb[22].mxu1  ;;  %v1697_v28 = vpop.f32.mrb[24].mxu0 }
 0x729   : > { %v1704_v30 = vmul.f32 0.35355338, %v1697_v28  ;;  %v2924_v31 = vpop.f32.mrb[23].mxu1  ;;  %v2929_v32 = vpop.f32.mrb[25].mxu0  ;;  %v1705_v33 = vsel %vm1169_vm3, %v1703_v25, -inf }
 0x72a   : > { %1706 = vmax.xlane.f32.xlu0 %v1705_v33  ;;  %v1700_v35 = vpop.f32.mrb[26].mxu0 }
 0x72b   : > { %v2930_v36 = vpop.f32.mrb[27].mxu0  ;;  %v1708_v37 = vsel %vm1169_vm3, %v1704_v30, -inf }
 0x72c   : > { %1709 = vmax.xlane.f32.xlu1 %v1708_v37 }
 0x73d   : > { %1777 = vrot.lane.b32.xlu1 %v4058_v40, %s3496_s19 }
 0x741   : > { %1827 = vrot.lane.b32.xlu1 %v4030_v19, %s3497_s6 }
 0x745   : > { %1877 = vrot.lane.b32.xlu1 %v4032_v24, %s3497_s6 }
 0x749   : > { %1875 = vrot.lane.b32.xlu1 %v4044_v34, %s3497_s6 }
 0x7b7   : > { %v1707_v38 = vpop.xlane.xlu0 %1706 }
 0x7b8   : > { %v1711_v41 = vsub.f32 %v1703_v25, %v1707_v38 }
 0x7b9   : > { %v1710_v42 = vpop.xlane.xlu1 %1709 }
 0x7ba   : > { %v1713_v43 = vmul.f32 1.442695, %v1711_v41  ;;  %v1712_v44 = vsub.f32 %v1704_v30, %v1710_v42 }
 0x7bc   : > { %3134 = vpow2.f32 %v1713_v43  ;;  %v1715_v45 = vmul.f32 1.442695, %v1712_v44 }
 0x7bd   : > { %v1778_v46 = vpop.permute.xlu1 %1777 }
 0x7be   : > { %3136 = vpow2.f32 %v1715_v45  ;;  %v1783_v47 = vsel %vm1291_vm4, %v1778_v46, 0 }
 0x7bf   : > { %2938 = vmatpush3.bf16.msra.mxu0 %v1783_v47 }
 0x7c0   : > { %2949 = vmatprep.subr.bf16.mxu0 %v3493_v3 }
 0x7c1   : > { %v1828_v54 = vpop.permute.xlu1 %1827 }
 0x7c5   : > { %v1878_v59 = vpop.permute.xlu1 %1877 }
 0x7c6   : > { %v3135_v19 = vpop.eup %3134  ;;  %v1883_v61 = vsel %vm1169_vm3, %v1878_v59, 0 }
 0x7c7   : > { %v1717_v24 = vsel %vm1169_vm3, %v3135_v19, 0.0 }
 0x7c8   : > { %v3137_v48 = vpop.eup %3136  ;;  %1718 = vadd.xlane.f32.xlu0 %v1717_v24 }
 0x7c9   : > { %v1720_v34 = vsel %vm1169_vm3, %v3137_v48, 0.0  ;;  %v1876_v63 = vpop.permute.xlu1 %1875 }
 0x7cc   : > { %1721 = vadd.xlane.f32.xlu0 %v1720_v34 }
 0x7e2   : > { %1729 = vrot.lane.b32.xlu0 %v4056_v39, %s3496_s19 }
 0x7e6   : > { %1825 = vrot.lane.b32.xlu0 %v4041_v29, %s3497_s6  ;;  %v1833_v29 = vsel %vm1169_vm3, %v1828_v54, 0 }
 0x855   : > { %v1719_v49 = vpop.xlane.xlu0 %1718 }
 0x856   : > { %3138 = vrcp.f32 %v1719_v49  ;;  %v3110_v49 = vld [vmem:[%s3974_s29] sm:$0xff]  }
 0x859   : > { %v1722_v50 = vpop.xlane.xlu0 %1721 }
 0x85a   : > { %3140 = vrcp.f32 %v1722_v50  ;;  %v3111_v50 = vld [vmem:[%s3974_s29 + $0x8] sm:$0xff]   ;;  %s4352_s29 = scalar_lea.vmem [#allocation7], %s3917_s17 }
 0x85d   : > { %v1730_v51 = vpop.permute.xlu0 %1729 }
 0x85e   : > { %v1735_v52 = vsel %vm1291_vm4, %v1730_v51, 0 }
 0x85f   : > { %2932 = vmatpush3.bf16.msra.mxu1 %v1735_v52 }
 0x860   : > { %v3139_v53 = vpop.eup %3138  ;;  %2943 = vmatprep.subr.bf16.mxu1 %v3493_v3 }
 0x861   : > { %v1725_v55 = vmul.f32 %v3139_v53, %v3135_v19  ;;  %v1826_v62 = vpop.permute.xlu0 %1825 }
 0x863   : > { %v1727_v56 = vpack.c.bf16 %v1725_v55, %v1725_v55 }
 0x864   : > { %v3141_v57 = vpop.eup %3140 }
 0x865   : > { %v1726_v58 = vmul.f32 %v3141_v57, %v3137_v48  ;;  %2934 = vmatmul.mubr.msk.bf16.vlgmr.msra.gmra.mrb[24].mxu1 %vm1169_vm3, %v1727_v56 }
 0x866   : > { %2945 = vmatprep.mubr.msk.bf16.mxu1 %vm3494_vm1, %v3493_v3 }
 0x867   : > { %v1728_v60 = vpack.c.bf16 %v1726_v58, %v1726_v58 }
 0x868   : > { %2944 = vmatpush3.bf16.xpose.msra.mxu1 %v1833_v29 }
 0x869   : > { %2940 = vmatmul.mubr.msk.bf16.vlgmr.msra.gmra.mrb[28].mxu0 %vm1169_vm3, %v1728_v60  ;;  %2955 = vmatprep.subr.bf16.mxu1 %v3493_v3 }
 0x86a   : > { %2950 = vmatpush3.bf16.xpose.msra.mxu0 %v1883_v61  ;;  %2951 = vmatprep.mubr.msk.bf16.mxu0 %vm3494_vm1, %v3493_v3 }
 0x86b   : > { %2961 = vmatprep.subr.bf16.mxu0 %v3493_v3 }
 0x86f   : > { %2946 = vmatmul.mubr.msk.bf16.vlgmr.msra.gmra.mrb[28].mxu1 %vm1169_vm3, %v1826_v62 }
 0x870   : > { %2957 = vmatprep.mubr.msk.bf16.mxu1 %vm3494_vm1, %v3493_v3 }
 0x871   : > { %2952 = vmatmul.mubr.msk.bf16.vlgmr.msra.gmra.mrb[32].mxu0 %vm1169_vm3, %v1876_v63 }
 0x872   : > { %2963 = vmatprep.mubr.msk.bf16.mxu0 %vm3494_vm1, %v3493_v3 }
 0x938   : > { %v1771_v0 = vpop.f32.mrb[24].mxu1 }
 0x939   : > { %v2935_v1 = vpop.f32.mrb[25].mxu1 }
 0x93a   : > { %v1774_v2 = vpop.f32.mrb[26].mxu1 }
 0x93b   : > { %v2936_v4 = vpop.f32.mrb[27].mxu1 }
 0x93c   : > { %v1819_v5 = vpop.f32.mrb[28].mxu0 }
 0x93d   : > { %v3094_v8 = vpack.i.bf16 %v1819_v5, %v1771_v0  ;;  %v2941_v9 = vpop.f32.mrb[29].mxu0 }
 0x93e   : > { %v1822_v10 = vpop.f32.mrb[30].mxu0 }
 0x93f   : > { %v2942_v12 = vpop.f32.mrb[31].mxu0 }
 0x942   : > { %v1869_v13 = vpop.f32.mrb[28].mxu1 }
 0x943   : > { %v1925_v14 = vmul.f32 0.35355338, %v1869_v13  ;;  %v2947_v17 = vpop.f32.mrb[29].mxu1 }
 0x944   : > { %v1872_v20 = vpop.f32.mrb[30].mxu1  ;;  %v1919_v21 = vpop.f32.mrb[32].mxu0  ;;  %v2762_v17 = vld [vmem:[%s4352_s29] ss:$0 sm:$0xff] }
 0x945   : > { %v1926_v22 = vmul.f32 0.35355338, %v1919_v21  ;;  %v2948_v25 = vpop.f32.mrb[31].mxu1  ;;  %v2953_v26 = vpop.f32.mrb[33].mxu0  ;;  %v1927_v27 = vsel %vm1169_vm3, %v1925_v14, -inf }
 0x946   : > { %1928 = vmax.xlane.f32.xlu0 %v1927_v27  ;;  %v1922_v28 = vpop.f32.mrb[34].mxu0 }
 0x947   : > { %v2954_v30 = vpop.f32.mrb[35].mxu0  ;;  %v1930_v31 = vsel %vm1169_vm3, %v1926_v22, -inf }
 0x948   : > { %1931 = vmax.xlane.f32.xlu1 %v1930_v31 }
 0x959   : > { %1999 = vrot.lane.b32.xlu1 %v4058_v40, %s3497_s6 }
 0x95d   : > { %3090 = vrot.lane.b32.xlu1 %v3089_v16, %s3498_s15 }
 0x961   : > { %3095 = vrot.lane.b32.xlu1 %v3094_v8, %s3499_s20 }
 0x9d3   : > { %v1929_v32 = vpop.xlane.xlu0 %1928 }
 0x9d4   : > { %v1933_v33 = vsub.f32 %v1925_v14, %v1929_v32 }
 0x9d5   : > { %v1932_v35 = vpop.xlane.xlu1 %1931 }
 0x9d6   : > { %v1935_v36 = vmul.f32 1.442695, %v1933_v33  ;;  %v1934_v37 = vsub.f32 %v1926_v22, %v1932_v35 }
 0x9d8   : > { %3142 = vpow2.f32 %v1935_v36  ;;  %v1937_v38 = vmul.f32 1.442695, %v1934_v37 }
 0x9d9   : > { %v2000_v41 = vpop.permute.xlu1 %1999 }
 0x9da   : > { %3144 = vpow2.f32 %v1937_v38  ;;  %v2005_v42 = vsel %vm1291_vm4, %v2000_v41, 0 }
 0x9db   : > { %2962 = vmatpush3.bf16.msra.mxu0 %v2005_v42  ;;  %v3112_v42 = vld [vmem:[%s3939_s13] sm:$0xff]  }
 0x9dc   : > { %2975 = vmatprep.subr.bf16.mxu0 %v3493_v3 }
 0x9dd   : > { %v3091_v29 = vpop.permute.xlu1 %3090 }
 0x9de   : > { %v3093_v61 = vunpack.i.h.bf16 %v3091_v29  ;;  %v3092_v62 = vunpack.i.l.bf16 %v3091_v29 }
 0x9e0   : > { %v2072_v2 = vsel %vm1169_vm3, %v4094_v23, %v3093_v61  ;;  %v2071_v4 = vsel %vm1169_vm3, %v4092_v18, %v3092_v62 }
 0x9e1   : > { %v3096_v60 = vpop.permute.xlu1 %3095 }
 0x9e2   : > { %v3143_v40 = vpop.eup %3142  ;;  %v3098_v63 = vunpack.i.h.bf16 %v3096_v60  ;;  %v3097_v0 = vunpack.i.l.bf16 %v3096_v60 }
 0x9e3   : > { %v1939_v11 = vsel %vm1169_vm3, %v3143_v40, 0.0 }
 0x9e4   : > { %v3145_v15 = vpop.eup %3144  ;;  %1940 = vadd.xlane.f32.xlu0 %v1939_v11  ;;  %v2074_v9 = vsel %vm2073_vm5, %v2071_v4, %v3097_v0  ;;  %v2075_v10 = vsel %vm2073_vm5, %v2072_v2, %v3098_v63  ;;  %v3114_v11 = vld [vmem:[%s3984_s9] sm:$0xff]  }
 0x9e5   : > { %v1942_v16 = vsel %vm1169_vm3, %v3145_v15, 0.0  ;;  %v2772_v2 = vld [vmem:[%s4356_s11] ss:$0 sm:$0xff] }
 0x9e8   : > { %1943 = vadd.xlane.f32.xlu0 %v1942_v16 }
 0x9fe   : > { %1951 = vrot.lane.b32.xlu0 %v4056_v39, %s3497_s6 }
 0xa71   : > { %v1941_v43 = vpop.xlane.xlu0 %1940 }
 0xa72   : > { %3146 = vrcp.f32 %v1941_v43 }
 0xa75   : > { %v1944_v44 = vpop.xlane.xlu0 %1943 }
 0xa76   : > { %3148 = vrcp.f32 %v1944_v44 }
 0xa79   : > { %v1952_v45 = vpop.permute.xlu0 %1951 }
 0xa7a   : > { %v1957_v46 = vsel %vm1291_vm4, %v1952_v45, 0 }
 0xa7b   : > { %2956 = vmatpush3.bf16.msra.mxu1 %v1957_v46 }
 0xa7c   : > { %v3147_v47 = vpop.eup %3146  ;;  %2967 = vmatprep.subr.bf16.mxu1 %v3493_v3 }
 0xa7d   : > { %v1947_v19 = vmul.f32 %v3147_v47, %v3143_v40  ;;  %v3113_v40 = vld [vmem:[%s3939_s13 + $0x8] sm:$0xff]   ;;  %s4353_s13 = scalar_lea.vmem [#allocation8], %s3917_s17 }
 0xa7f   : > { %v1949_v24 = vpack.c.bf16 %v1947_v19, %v1947_v19 }
 0xa80   : > { %v3149_v48 = vpop.eup %3148 }
 0xa81   : > { %v1948_v34 = vmul.f32 %v3149_v48, %v3145_v15  ;;  %2958 = vmatmul.mubr.msk.bf16.vlgmr.msra.gmra.mrb[32].mxu1 %vm1169_vm3, %v1949_v24  ;;  %v3115_v15 = vld [vmem:[%s3984_s9 + $0x8] sm:$0xff]   ;;  %v2766_v48 = vld [vmem:[%s4353_s13] ss:$0 sm:$0xff] }
 0xa82   : > { %2971 = vmatprep.mubr.msk.bf16.mxu1 %vm3494_vm1, %v3493_v3  ;;  %2968 = vmatpush3.bf16.msra.mxu1 %v3110_v49 }
 0xa83   : > { %v1950_v39 = vpack.c.bf16 %v1948_v34, %v1948_v34  ;;  %2969 = vmatprep.subr.bf16.mxu1 %v3493_v3 }
 0xa85   : > { %2964 = vmatmul.mubr.msk.bf16.vlgmr.msra.gmra.mrb[36].mxu0 %vm1169_vm3, %v1950_v39 }
 0xa86   : > { %2979 = vmatprep.mubr.msk.bf16.mxu0 %vm3494_vm1, %v3493_v3  ;;  %2970 = vmatpush3.bf16.msra.mxu1 %v3111_v50  ;;  %v2767_v50 = vld [vmem:[%s4354_s22] ss:$0 sm:$0xff] }
 0xa87   : > { %2983 = vmatprep.subr.bf16.mxu1 %v3493_v3  ;;  %2976 = vmatpush3.bf16.msra.mxu0 %v3112_v42  ;;  %v2779_v42 = vld [vmem:[%s802_s24] ss:$0 sm:$0xff] }
 0xa88   : > { %2977 = vmatprep.subr.bf16.mxu0 %v3493_v3 }
 0xa8b   : > { %2978 = vmatpush3.bf16.msra.mxu0 %v3113_v40 }
 0xb54   : > { %v1993_v51 = vpop.f32.mrb[32].mxu1 }
 0xb55   : > { %v2959_v52 = vpop.f32.mrb[33].mxu1 }
 0xb56   : > { %v1996_v53 = vpop.f32.mrb[34].mxu1 }
 0xb57   : > { %v2960_v54 = vpop.f32.mrb[35].mxu1 }
 0xb58   : > { %v2041_v55 = vpop.f32.mrb[36].mxu0 }
 0xb59   : > { %v3099_v56 = vpack.i.bf16 %v2041_v55, %v1993_v51  ;;  %v2965_v57 = vpop.f32.mrb[37].mxu0  ;;  %v3116_v55 = vld [vmem:[%s3984_s9 + $0x10] sm:$0xff]  }
 0xb5a   : > { %v2044_v58 = vpop.f32.mrb[38].mxu0  ;;  %v2768_v57 = vld [vmem:[%s4355_s7] ss:$0 sm:$0xff] }
 0xb5b   : > { %3100 = vrot.lane.b32.xlu0 %v3099_v56, %s3500_s21  ;;  %v2966_v59 = vpop.f32.mrb[39].mxu0  ;;  %v3117_v56 = vld [vmem:[%s3984_s9 + $0x18] sm:$0xff]  }
 0xbcd   : > { %v3101_v1 = vpop.permute.xlu0 %3100 }
 0xbce   : > { %v3103_v5 = vunpack.i.h.bf16 %v3101_v1  ;;  %v3102_v8 = vunpack.i.l.bf16 %v3101_v1 }
 0xbd0   : > { %v2078_v12 = vsel %vm2076_vm6, %v2075_v10, %v3103_v5  ;;  %v2077_v13 = vsel %vm2076_vm6, %v2074_v9, %v3102_v8 }
 0xbd1   : > { %v2079_v14 = vpack.c.bf16 %v2078_v12, %v2077_v13 }
 0xbd3   : > { %2972 = vmatmul.mubr.msk.bf16.vlgmr.msra.gmra.mrb[36].mxu1 %vm978_vm2, %v2079_v14 }
 0xbd4   : > { %2991 = vmatprep.mubr.msk.bf16.mxu1 %vm3494_vm1, %v3493_v3  ;;  %2984 = vmatpush3.bf16.msra.mxu1 %v3114_v11 }
 0xbd5   : > { %2985 = vmatprep.subr.bf16.mxu1 %v3493_v3 }
 0xbd8   : > { %2986 = vmatpush3.bf16.msra.mxu1 %v3115_v15 }
 0xbd9   : > { %2987 = vmatprep.subr.bf16.mxu1 %v3493_v3 }
 0xbdc   : > { %2988 = vmatpush3.bf16.msra.mxu1 %v3116_v55 }
 0xbdd   : > { %2989 = vmatprep.subr.bf16.mxu1 %v3493_v3 }
 0xbe0   : > { %2990 = vmatpush3.bf16.msra.mxu1 %v3117_v56 }
 0xca6   : > { %v2140_v20 = vpop.f32.mrb[36].mxu1 }
 0xca7   : > { %v2141_v21 = vadd.f32 %v2762_v17, %v2140_v20  ;;  %v2973_v23 = vpop.f32.mrb[37].mxu1 }
 0xca8   : > { %v2143_v22 = vpop.f32.mrb[38].mxu1 }
 0xca9   : > { %v2144_v25 = vadd.f32 %v2762_v17, %v2143_v22  ;;  %v2974_v18 = vpop.f32.mrb[39].mxu1  ;;  %v2147_v26 = vadd.f32 %v2141_v21, %v3999_v6 }
 0xcab   : > { %v2151_v27 = vsel %vm978_vm2, %v2147_v26, 0.0  ;;  %v2148_v28 = vadd.f32 %v2144_v25, %v4001_v7 }
 0xcac   : > { %2152 = vadd.xlane.f32.xlu1 %v2151_v27 }
 0xcad   : > { %v2154_v30 = vsel %vm978_vm2, %v2148_v28, 0.0 }
 0xcae   : > { %2155 = vadd.xlane.f32.xlu0 %v2154_v30 }
 0xd39   : > { %v2153_v31 = vpop.xlane.xlu1 %2152 }
 0xd3a   : > { %v2158_v32 = vmul.f32 0.03125, %v2153_v31 }
 0xd3b   : > { %v2156_v33 = vpop.xlane.xlu0 %2155 }
 0xd3c   : > { %v2160_v35 = vsub.f32 %v2147_v26, %v2158_v32  ;;  %v2159_v36 = vmul.f32 0.03125, %v2156_v33 }
 0xd3e   : > { %v2161_v37 = vsub.f32 %v2148_v28, %v2159_v36  ;;  %v2162_v38 = vmul.f32 %v2160_v35, %v2160_v35 }
 0xd40   : > { %v2164_v6 = vsel %vm978_vm2, %v2162_v38, 0.0  ;;  %v2163_v41 = vmul.f32 %v2161_v37, %v2161_v37 }
 0xd41   : > { %2165 = vadd.xlane.f32.xlu0 %v2164_v6  ;;  %v2778_v6 = vld [vmem:[%s941_s18] ss:$0 sm:$0xff]  ;;  %s3501_s18 = smov (!%p2780_p13), 1e-12  }
 0xd42   : > { %v2167_v7 = vsel %vm978_vm2, %v2163_v41, 0.0 }
 0xd45   : > { %2168 = vadd.xlane.f32.xlu0 %v2167_v7 }
 0xdce   : > { %v2166_v16 = vpop.xlane.xlu0 %2165 }
 0xdcf   : > { %v2170_v43 = vmul.f32 0.03125, %v2166_v16 }
 0xdd1   : > { %v2172_v44 = vadd.f32 1e-05, %v2170_v43 }
 0xdd2   : > { %v2169_v45 = vpop.xlane.xlu0 %2168 }
 0xdd3   : > { %3150 = vrsqrt.f32 %v2172_v44  ;;  %v2171_v46 = vmul.f32 0.03125, %v2169_v45 }
 0xdd5   : > { %v2173_v47 = vadd.f32 1e-05, %v2171_v46 }
 0xdd7   : > { %3152 = vrsqrt.f32 %v2173_v47 }
 0xddd   : > { %v3151_v19 = vpop.eup %3150 }
 0xdde   : > { %v2176_v24 = vmul.f32 %v3151_v19, %v2160_v35 }
 0xde0   : > { %v2184_v39 = vmul.f32 %v2766_v48, %v2176_v24 }
 0xde1   : > { %v3153_v34 = vpop.eup %3152 }
 0xde2   : > { %v2177_v49 = vmul.f32 %v3153_v34, %v2161_v37  ;;  %v2192_v52 = vadd.f32 %v2767_v50, %v2184_v39 }
 0xde4   : > { %v2185_v51 = vmul.f32 %v2766_v48, %v2177_v49 }
 0xde6   : > { %v2193_v53 = vadd.f32 %v2767_v50, %v2185_v51 }
 0xde8   : > { %v2194_v54 = vpack.c.bf16 %v2193_v53, %v2192_v52 }
 0xdea   : > { %2980 = vmatmul.mubr.msk.bf16.vlgmr.msra.gmra.mrb[40].mxu0 %vm978_vm2, %v2194_v54 }
 0xebd   : > { %v2255_v58 = vpop.f32.mrb[40].mxu0 }
 0xebe   : > { %v2256_v59 = vadd.f32 %v2768_v57, %v2255_v58  ;;  %v2981_v29 = vpop.f32.mrb[41].mxu0 }
 0xebf   : > { %v2258_v60 = vpop.f32.mrb[42].mxu0 }
 0xec0   : > { %v2259_v61 = vadd.f32 %v2768_v57, %v2258_v60  ;;  %v2982_v62 = vpop.f32.mrb[43].mxu0  ;;  %v2262_v63 = vmax.f32 %v2256_v59, 0.0 }
 0xec2   : > { %v2263_v0 = vmax.f32 %v2259_v61, 0.0 }
 0xec4   : > { %v2264_v1 = vpack.c.bf16 %v2263_v0, %v2262_v63 }
 0xec6   : > { %2992 = vmatmul.mubr.msk.bf16.vlgmr.msra.gmra.mrb[40].mxu1 %vm2304_vm7, %v2264_v1 }
 0xf99   : > { %v2342_v4 = vpop.f32.mrb[40].mxu1 }
 0xf9a   : > { %v2343_v5 = vadd.f32 %v2772_v2, %v2342_v4  ;;  %v2993_v3 = vpop.f32.mrb[41].mxu1 }
 0xf9b   : > { %v2345_v8 = vpop.f32.mrb[42].mxu1 }
 0xf9c   : > { %v2346_v9 = vadd.f32 %v2772_v2, %v2345_v8  ;;  %v2994_v10 = vpop.f32.mrb[43].mxu1  ;;  %v2349_v12 = vadd.f32 %v2343_v5, %v2192_v52 }
 0xf9e   : > { %v2353_v13 = vsel %vm978_vm2, %v2349_v12, 0.0  ;;  %v2350_v14 = vadd.f32 %v2346_v9, %v2193_v53 }
 0xf9f   : > { %2354 = vadd.xlane.f32.xlu1 %v2353_v13 }
 0xfa0   : > { %v2356_v17 = vsel %vm978_vm2, %v2350_v14, 0.0 }
 0xfa1   : > { %2357 = vadd.xlane.f32.xlu0 %v2356_v17 }
0x102c   : > { %v2355_v20 = vpop.xlane.xlu1 %2354 }
0x102d   : > { %v2359_v21 = vmul.f32 0.03125, %v2355_v20 }
0x102e   : > { %v2358_v23 = vpop.xlane.xlu0 %2357 }
0x102f   : > { %v2361_v22 = vsub.f32 %v2349_v12, %v2359_v21  ;;  %v2360_v25 = vmul.f32 0.03125, %v2358_v23 }
0x1031   : > { %v2362_v18 = vsub.f32 %v2350_v14, %v2360_v25  ;;  %v2363_v26 = vmul.f32 %v2361_v22, %v2361_v22 }
0x1033   : > { %v2365_v27 = vsel %vm978_vm2, %v2363_v26, 0.0  ;;  %v2364_v28 = vmul.f32 %v2362_v18, %v2362_v18 }
0x1034   : > { %2366 = vadd.xlane.f32.xlu1 %v2365_v27 }
0x1035   : > { %v2368_v30 = vsel %vm978_vm2, %v2364_v28, 0.0 }
0x1036   : > { %2369 = vadd.xlane.f32.xlu0 %v2368_v30 }
0x10c1   : > { %v2367_v31 = vpop.xlane.xlu1 %2366 }
0x10c2   : > { %v2371_v32 = vmul.f32 0.03125, %v2367_v31 }
0x10c3   : > { %v2370_v33 = vpop.xlane.xlu0 %2369 }
0x10c4   : > { %v2373_v35 = vadd.f32 1e-05, %v2371_v32  ;;  %v2372_v36 = vmul.f32 0.03125, %v2370_v33 }
0x10c6   : > { %3154 = vrsqrt.f32 %v2373_v35  ;;  %v2374_v37 = vadd.f32 1e-05, %v2372_v36 }
0x10c8   : > { %3156 = vrsqrt.f32 %v2374_v37 }
0x10d0   : > { %v3155_v38 = vpop.eup %3154 }
0x10d1   : > { %v2377_v41 = vmul.f32 %v3155_v38, %v2361_v22 }
0x10d2   : > { %v3157_v7 = vpop.eup %3156 }
0x10d3   : > { %v2385_v40 = vmul.f32 %v2778_v6, %v2377_v41  ;;  %v2378_v11 = vmul.f32 %v3157_v7, %v2362_v18  ;;  %2400 = sbr.rel (%p2780_p13) target bundleno = 4542 (0x11be), region = 132 }
0x10d5   : > { %v2393_v15 = vadd.f32 %v2779_v42, %v2385_v40  ;;  %v2386_v16 = vmul.f32 %v2778_v6, %v2378_v11 }
0x10d7   : > { %2395 = vst.msk [vmem:[#allocation2] sm:$0xff] %vm978_vm2, %v2393_v15  ;;  %v2394_v43 = vadd.f32 %v2779_v42, %v2386_v16  ;;  %v2401_v44 = vsel (!%p2780_p13), %vm978_vm2, %v2393_v15, inf  ;;  %v2413_v46 = vsel (!%p2780_p13), %vm978_vm2, %v2393_v15, -inf }
0x10d9   : > { %2396 = vst.msk [vmem:[#allocation2 + $0x8] sm:$0xff] %vm978_vm2, %v2394_v43  ;;  %v2402_v45 = vsel (!%p2780_p13), %vm978_vm2, %v2394_v43, inf  ;;  %v2414_v47 = vsel (!%p2780_p13), %vm978_vm2, %v2394_v43, -inf }
0x10da   : > { %v2403_v19 = vmin.f32 %v2401_v44, %v2402_v45  ;;  %v2415_v24 = vmax.f32 %v2413_v46, %v2414_v47 }
0x10dc   : > { %2404 = vmin.xlane.f32.xlu0 %v2403_v19 }
0x10e0   : > { %2416 = vmax.xlane.f32.xlu0 %v2415_v24 }
0x1169   : > { %v2405_v48 = vpop.xlane.xlu0 %2404 }
0x116a   : > { %v2406_v34 = vrot.slane %v2405_v48, 4 }
0x116c   : > { %v2407_v39 = vmin.f32 %v2405_v48, %v2406_v34 }
0x116d   : > { %v2417_v49 = vpop.xlane.xlu0 %2416 }
0x116e   : > { %v2408_v50 = vrot.slane %v2407_v39, 2  ;;  %v2418_v51 = vrot.slane %v2417_v49, 4 }
0x1170   : > { %v2419_v52 = vmax.f32 %v2417_v49, %v2418_v51  ;;  %v2409_v53 = vmin.f32 %v2407_v39, %v2408_v50 }
0x1172   : > { %v2420_v54 = vrot.slane %v2419_v52, 2  ;;  %v2410_v55 = vrot.slane %v2409_v53, 1 }
0x1174   : > { %v2421_v56 = vmax.f32 %v2419_v52, %v2420_v54  ;;  %v2411_v57 = vmin.f32 %v2409_v53, %v2410_v55 }
0x1176   : > { %2995 = vpush %v2411_v57  ;;  %v2422_v58 = vrot.slane %v2421_v56, 1 }
0x1178   : > { %v2423_v59 = vmax.f32 %v2421_v56, %v2422_v58 }
0x117a   : > { %2997 = vpush %v2423_v59 }
0x11a7   : > { %s2996_s28 = spop %2995 }
0x11a8   : > { %v2425_v60 = vstv %s2996_s28 }
0x11a9   : > { %v2426_v61 = vsub.f32 %v2393_v15, %v2425_v60  ;;  %v2427_v62 = vsub.f32 %v2394_v43, %v2425_v60 }
0x11ab   : > { %s2998_s17 = spop %2997 }
0x11ac   : > { %s2428_s1 = ssub.f32 %s2998_s17, %s2996_s28 }
0x11ae   : > { %s2429_s24 = smax.f32 %s3501_s18, %s2428_s1 }
0x11af   : > { %v2430_v29 = vstv %s2429_s24 }
0x11b0   : > { %3158 = vrcp.f32 %v2430_v29 }
0x11ba   : > { %v3159_v63 = vpop.eup %3158 }
0x11bb   : > { %v2432_v0 = vmul.f32 %v3159_v63, %v2426_v61  ;;  %v2433_v1 = vmul.f32 %v3159_v63, %v2427_v62 }
0x11bd   : > { %2434 = vst.msk [vmem:[%s4358_s0] sm:$0xff] %vm978_vm2, %v2432_v0  ;;  %2435 = vst.msk [vmem:[%s4358_s0 + $0x8] sm:$0xff] %vm978_vm2, %v2433_v1 }
0x11be PF: > { %s4359_s27 = sld [smem:[#allocation23_spill]]  ;;  %s4360_s3 = sld [smem:[#allocation22_spill]] }
0x11bf   : > { %s4361_s26 = sld [smem:[#allocation24_spill]]  ;;  %s4362_s24 = smov %s3472_s25 }
0x11c4   : > { %p39_p9 = scmp.ge.s32.totalorder %s4359_s27, 4   ;;  %s4363_s25 = smov %s4360_s3 }
0x11c6   :  { %41 = sbr.rel (!%p39_p9) target bundleno = 25 (0x19), region = 249 }
0x11cd   :  { %2447 = vsyncpa [#allocation4], 1 }
0x11ce   :  { %2449 = vsyncpa [#allocation4 + $0x1], 1 }
0x11cf   :  { %2450 = vsyncpa [#allocation6], 1 }
0x11d0   :  { %2452 = vsyncpa [#allocation6 + $0x1], 1 }
0x11d1   :  { %2453 = vsyncpa [#allocation9], 1 }
0x11d2   :  { %2455 = vsyncpa [#allocation9 + $0x1], 1 }
0x11d3   :  { %2456 = vsyncpa [#allocation12], 1 }
0x11d4   :  { %2458 = vsyncpa [#allocation12 + $0x1], 1 }
0x11d5   :  { %2459 = vsyncpa [#allocation15], 1 }
0x11d6   :  { %2461 = vsyncpa [#allocation15 + $0x1], 1 }

</bundles_post_ra>
